<compile_context>
chip_gen: v5e
topology: v5e:2x2
jax: 0.10.0
libtpu: 0.0.40
codegen_flags: <defaults>
</compile_context>

<pallas_src>
import functools

import jax
import jax.numpy as jnp
import numpy as np
from jax.experimental import pallas as pl
from jax.experimental.pallas import tpu as pltpu

_LN_EPS = 1e-5


def _layer_norm(x, gamma, beta):
    mu = jnp.mean(x, axis=-1, keepdims=True)
    var = jnp.mean(jnp.square(x - mu), axis=-1, keepdims=True)
    return (x - mu) * jax.lax.rsqrt(var + _LN_EPS) * gamma + beta


def _sigmoid(x):
    # tanh form: numerically stable and lowers to the EUP on all generations.
    return 0.5 * (jnp.tanh(0.5 * x) + 1.0)


# --------------------------------------------------------------------------- #
# Kernel 1: LayerNorm1 + fused (QKV + gate-logit) projection + contextual gate #
# --------------------------------------------------------------------------- #
def _proj_kernel(h_ref, ctxq_ref, ctxk_ref, cqg_ref, ckg_ref,
                 ln1_g_ref, ln1_b_ref, w_ref, b_ref,
                 ln1_out_ref, qhat_ref, khat_ref, val_ref, *,
                 hidden_size, scale):
    H = hidden_size
    h = h_ref[0]                                        # [BS, H] f32

    ln1 = _layer_norm(h, ln1_g_ref[...], ln1_b_ref[...])            # f32

    # Fused projection (bf16 MXU, f32 accumulation). Weight columns are
    #   [ Wq | Wk | Wv | Wq@g_qh | Wk@g_kh | 0-pad to lane multiple ]
    qkv = jnp.dot(ln1.astype(jnp.bfloat16), w_ref[...],
                  preferred_element_type=jnp.float32) + b_ref[...]  # [BS, 3H+pad]

    q = qkv[:, :H]
    k = qkv[:, H:2 * H]
    v = qkv[:, 2 * H:3 * H]

    # Gate logits come straight out of the MXU; add the per-batch context term.
    q_gate = _sigmoid(qkv[:, 3 * H:3 * H + 1] + cqg_ref[0])         # [BS, 1]
    k_gate = _sigmoid(qkv[:, 3 * H + 1:3 * H + 2] + ckg_ref[0])     # [BS, 1]

    ctx_q = ctxq_ref[0]                                 # [1, H] f32 (precomputed ctx@Wcq)
    ctx_k = ctxk_ref[0]                                 # [1, H] f32 (precomputed ctx@Wck)

    # 1/sqrt(H) folded into q_hat here (scores stay mathematically identical).
    q_hat = ((1.0 - q_gate) * q + q_gate * ctx_q) * scale
    k_hat = (1.0 - k_gate) * k + k_gate * ctx_k

    ln1_out_ref[0] = ln1.astype(ln1_out_ref.dtype)      # bf16 slab
    qhat_ref[0] = q_hat.astype(qhat_ref.dtype)          # bf16 slab (pre-scaled)
    khat_ref[0] = k_hat.astype(khat_ref.dtype)          # bf16 slab
    val_ref[0] = v.astype(val_ref.dtype)                # bf16 slab


# --------------------------------------------------------------------------- #
# Kernel 2: flash attention (online softmax) + residual + LayerNorm2           #
# --------------------------------------------------------------------------- #
def _attn_kernel(qhat_ref, khat_ref, val_ref, ln1_ref, ln2_g_ref, ln2_b_ref,
                 out_ref, scores_ref, m_scr, l_scr, acc_scr):
    ki = pl.program_id(2)
    nk = pl.num_programs(2)

    @pl.when(ki == 0)
    def _():
        m_scr[...] = jnp.full_like(m_scr, -jnp.inf)
        l_scr[...] = jnp.zeros_like(l_scr)
        acc_scr[...] = jnp.zeros_like(acc_scr)

    q = qhat_ref[0]                                     # [BQ, H] bf16 (pre-scaled)
    k = khat_ref[0]                                     # [BK, H] bf16
    v = val_ref[0]                                      # [BK, H] bf16

    # q @ k^T (contract H on both sides) — bf16 MXU pass, f32 accumulation.
    s = jax.lax.dot_general(q, k, (((1,), (1,)), ((), ())),
                            preferred_element_type=jnp.float32)     # [BQ, BK]
    scores_ref[0] = s.astype(scores_ref.dtype)          # lane-dense score-tile store

    # Online softmax update (f32 accumulators in VMEM scratch).
    m_prev = m_scr[...]
    m_new = jnp.maximum(m_prev, jnp.max(s, axis=-1, keepdims=True))
    alpha = jnp.exp(m_prev - m_new)
    p = jnp.exp(s - m_new)
    l_scr[...] = alpha * l_scr[...] + jnp.sum(p, axis=-1, keepdims=True)
    acc_scr[...] = alpha * acc_scr[...] + jnp.dot(
        p.astype(v.dtype), v, preferred_element_type=jnp.float32)   # bf16 PV matmul
    m_scr[...] = m_new

    @pl.when(ki == nk - 1)
    def _():
        inv_l = pl.reciprocal(l_scr[...], approx=True)              # EUP, frees VALU slot
        attn = acc_scr[...] * inv_l                                 # [BQ, H] f32
        x = attn + ln1_ref[0].astype(jnp.float32)                   # residual (LN1 output)
        y = _layer_norm(x, ln2_g_ref[...], ln2_b_ref[...])
        out_ref[0] = y.astype(out_ref.dtype)                        # single store per q tile


# --------------------------------------------------------------------------- #
# Wrapper                                                                      #
# --------------------------------------------------------------------------- #
def contextual_attention_regularized(hidden_states, context_vector, params, *,
                                     block_s=512, block_q=512, block_k=512,
                                     vmem_limit_bytes=48 * 1024 * 1024):
    """Returns (output [B,S,H] f32, attention_scores [B,S,S] f32).

    Tiling guidance: block sizes of 512 (defaults) suit v5e/v6e (128 MiB VMEM);
    the 48 MiB vmem budget keeps the same config safe on v7x (64 MiB VMEM).
    H is ideally a multiple of 128 (lane width) for aligned column slices.
    """
    B, S, H = hidden_states.shape
    block_s = min(block_s, S)
    block_q = min(block_q, S)
    block_k = min(block_k, S)
    assert S % block_s == 0 and S % block_q == 0 and S % block_k == 0, (
        "seq_len must be divisible by the chosen tile sizes")

    f32 = jnp.float32
    scale = 1.0 / (float(H) ** 0.5)

    # ---- once-per-call prep in plain XLA (tiny) -----------------------------
    w_qkv = params["w_qkv"].astype(f32)                  # [H, 3H]  (columns: Wq|Wk|Wv)
    b_qkv = params["b_qkv"].astype(f32).reshape(1, 3 * H)
    g_qh = params["g_qh"].astype(f32).reshape(1, H)
    g_kh = params["g_kh"].astype(f32).reshape(1, H)
    g_qc = params["g_qc"].astype(f32).reshape(1, H)
    g_kc = params["g_kc"].astype(f32).reshape(1, H)

    # Gate-logit columns:  <q, g_qh> = ln1 @ (Wq @ g_qh) + <bq, g_qh>
    col_q = w_qkv[:, :H] @ g_qh.T                        # [H, 1]
    col_k = w_qkv[:, H:2 * H] @ g_kh.T                   # [H, 1]
    bias_gq = b_qkv[:, :H] @ g_qh.T                      # [1, 1]
    bias_gk = b_qkv[:, H:2 * H] @ g_kh.T                 # [1, 1]

    w_pad = (-(3 * H + 2)) % 128                         # pad fused width to lane multiple
    w_cols = 3 * H + 2 + w_pad
    w_ext = jnp.concatenate(
        [w_qkv, col_q, col_k, jnp.zeros((H, w_pad), f32)], axis=1).astype(jnp.bfloat16)
    b_ext = jnp.concatenate(
        [b_qkv, bias_gq, bias_gk, jnp.zeros((1, w_pad), f32)], axis=1)

    ctx = context_vector.astype(f32)                     # [B, H]
    ctx_q = (ctx @ params["w_cq"].astype(f32)).reshape(B, 1, H)
    ctx_k = (ctx @ params["w_ck"].astype(f32)).reshape(B, 1, H)
    ctx_qg = jnp.sum(ctx * g_qc, axis=-1).reshape(B, 1, 1)
    ctx_kg = jnp.sum(ctx * g_kc, axis=-1).reshape(B, 1, 1)

    ln1_g = params["ln1_g"].astype(f32).reshape(1, H)
    ln1_b = params["ln1_b"].astype(f32).reshape(1, H)
    ln2_g = params["ln2_g"].astype(f32).reshape(1, H)
    ln2_b = params["ln2_b"].astype(f32).reshape(1, H)

    # ---- Kernel 1: LN1 + fused QKV/gate projection --------------------------
    slab = jax.ShapeDtypeStruct((B, S, H), jnp.bfloat16)
    row_spec = pl.BlockSpec((1, block_s, H), lambda b, s: (b, s, 0))
    per_batch_vec = lambda: pl.BlockSpec((1, 1, H), lambda b, s: (b, 0, 0))
    per_batch_scalar = lambda: pl.BlockSpec((1, 1, 1), lambda b, s: (b, 0, 0))
    const_vec = lambda: pl.BlockSpec((1, H), lambda b, s: (0, 0))

    ln1_out, q_hat, k_hat, value = pl.pallas_call(
        functools.partial(_proj_kernel, hidden_size=H, scale=scale),
        out_shape=(slab, slab, slab, slab),
        grid_spec=pltpu.PrefetchScalarGridSpec(
            num_scalar_prefetch=0,
            grid=(B, S // block_s),
            in_specs=[
                row_spec,                                          # hidden_states
                per_batch_vec(), per_batch_vec(),                  # ctx@Wcq, ctx@Wck
                per_batch_scalar(), per_batch_scalar(),            # <ctx,g_qc>, <ctx,g_kc>
                const_vec(), const_vec(),                          # ln1 gamma / beta
                pl.BlockSpec((H, w_cols), lambda b, s: (0, 0)),    # fused W (bf16, resident)
                pl.BlockSpec((1, w_cols), lambda b, s: (0, 0)),    # fused bias (f32)
            ],
            out_specs=(row_spec, row_spec, row_spec, row_spec),
        ),
        compiler_params=pltpu.CompilerParams(
            dimension_semantics=("parallel", "parallel"),
            vmem_limit_bytes=vmem_limit_bytes,
        ),
    )(hidden_states.astype(f32), ctx_q, ctx_k, ctx_qg, ctx_kg,
      ln1_g, ln1_b, w_ext, b_ext)

    # ---- Kernel 2: flash attention + residual + LN2 -------------------------
    q_spec = pl.BlockSpec((1, block_q, H), lambda b, qi, ki: (b, qi, 0))
    kv_spec = pl.BlockSpec((1, block_k, H), lambda b, qi, ki: (b, ki, 0))
    vec_spec = lambda: pl.BlockSpec((1, H), lambda b, qi, ki: (0, 0))

    out, scores = pl.pallas_call(
        _attn_kernel,
        out_shape=(jax.ShapeDtypeStruct((B, S, H), jnp.float32),
                   jax.ShapeDtypeStruct((B, S, S), jnp.float32)),
        grid_spec=pltpu.PrefetchScalarGridSpec(
            num_scalar_prefetch=0,
            grid=(B, S // block_q, S // block_k),
            in_specs=[
                q_spec,                                            # q_hat (bf16, pre-scaled)
                kv_spec,                                           # k_hat (bf16)
                kv_spec,                                           # value (bf16)
                q_spec,                                            # ln1 (residual, bf16)
                vec_spec(), vec_spec(),                            # ln2 gamma / beta
            ],
            out_specs=(
                q_spec,                                            # output (resident over k)
                pl.BlockSpec((1, block_q, block_k),
                             lambda b, qi, ki: (b, qi, ki)),       # score tiles (f32)
            ),
            scratch_shapes=[
                pltpu.VMEM((block_q, 1), jnp.float32),             # running max
                pltpu.VMEM((block_q, 1), jnp.float32),             # running sum
                pltpu.VMEM((block_q, H), jnp.float32),             # output accumulator
            ],
        ),
        compiler_params=pltpu.CompilerParams(
            dimension_semantics=("parallel", "parallel", "arbitrary"),
            vmem_limit_bytes=vmem_limit_bytes,
        ),
    )(q_hat, k_hat, value, ln1_out, ln2_g, ln2_b)

    return out, scores


# --------------------------------------------------------------------------- #
# Pure-JAX reference (mirrors the PyTorch forward, eval mode, full f32)        #
# --------------------------------------------------------------------------- #
def _reference(hidden_states, context_vector, p):
    H = hidden_states.shape[-1]
    h = _layer_norm(hidden_states, p["ln1_g"], p["ln1_b"])
    qkv = h @ p["w_qkv"] + p["b_qkv"]
    q, k, v = qkv[..., :H], qkv[..., H:2 * H], qkv[..., 2 * H:]
    ctx = context_vector
    ctx_q = ctx @ p["w_cq"]
    ctx_k = ctx @ p["w_ck"]
    qg = jax.nn.sigmoid(jnp.sum(q * p["g_qh"], -1, keepdims=True)
                        + jnp.sum(ctx * p["g_qc"], -1, keepdims=True)[:, None, :])
    kg = jax.nn.sigmoid(jnp.sum(k * p["g_kh"], -1, keepdims=True)
                        + jnp.sum(ctx * p["g_kc"], -1, keepdims=True)[:, None, :])
    q_hat = (1.0 - qg) * q + qg * ctx_q[:, None, :]
    k_hat = (1.0 - kg) * k + kg * ctx_k[:, None, :]
    scores = jnp.einsum("bqh,bkh->bqk", q_hat, k_hat) / jnp.sqrt(jnp.float32(H))
    probs = jax.nn.softmax(scores, axis=-1)
    out = jnp.einsum("bqk,bkh->bqh", probs, v)
    out = _layer_norm(out + h, p["ln2_g"], p["ln2_b"])
    return out, scores


if __name__ == "__main__":
    # Small, 128-aligned shapes: grid (2,2) for kernel 1, (2,2,2) for kernel 2,
    # which exercises the multi-step online-softmax path.
    B, S, H = 2, 256, 128
    key = jax.random.PRNGKey(0)
    keys = jax.random.split(key, 16)
    w = 0.02

    hidden_states = jax.random.normal(keys[0], (B, S, H), jnp.float32)
    context_vector = jax.random.normal(keys[1], (B, H), jnp.float32)

    params = dict(
        ln1_g=1.0 + 0.1 * jax.random.normal(keys[2], (1, H), jnp.float32),
        ln1_b=0.1 * jax.random.normal(keys[3], (1, H), jnp.float32),
        w_qkv=w * jax.random.normal(keys[4], (H, 3 * H), jnp.float32),   # [in, 3*out]
        b_qkv=w * jax.random.normal(keys[5], (1, 3 * H), jnp.float32),
        w_cq=w * jax.random.normal(keys[6], (H, H), jnp.float32),        # context_query_proj.weight.T
        w_ck=w * jax.random.normal(keys[7], (H, H), jnp.float32),        # context_key_proj.weight.T
        g_qh=w * jax.random.normal(keys[8], (1, H), jnp.float32),
        g_kh=w * jax.random.normal(keys[9], (1, H), jnp.float32),
        g_qc=w * jax.random.normal(keys[10], (1, H), jnp.float32),
        g_kc=w * jax.random.normal(keys[11], (1, H), jnp.float32),
        ln2_g=1.0 + 0.1 * jax.random.normal(keys[12], (1, H), jnp.float32),
        ln2_b=0.1 * jax.random.normal(keys[13], (1, H), jnp.float32),
    )

    out, scores = contextual_attention_regularized(
        hidden_states, context_vector, params,
        block_s=128, block_q=128, block_k=128)
    out = jax.block_until_ready(out)
    scores = jax.block_until_ready(scores)

    ref_out, ref_scores = _reference(hidden_states, context_vector, params)
    np.testing.assert_allclose(np.asarray(scores), np.asarray(ref_scores),
                               rtol=2e-2, atol=2e-2)
    np.testing.assert_allclose(np.asarray(out), np.asarray(ref_out),
                               rtol=2e-2, atol=2e-2)
    print("KERNEL_OK")
</pallas_src>

<mosaic_0001>
module attributes {stable_mosaic.version = 11 : i64} {
  func.func @_proj_kernel(%arg0: i32, %arg1: i32, %arg2: memref<1x128x128xf32, #tpu.memory_space<vmem>>, %arg3: memref<1x1x128xf32, #tpu.memory_space<vmem>>, %arg4: memref<1x1x128xf32, #tpu.memory_space<vmem>>, %arg5: memref<1x1x1xf32, #tpu.memory_space<vmem>>, %arg6: memref<1x1x1xf32, #tpu.memory_space<vmem>>, %arg7: memref<1x128xf32, #tpu.memory_space<vmem>>, %arg8: memref<1x128xf32, #tpu.memory_space<vmem>>, %arg9: memref<128x512xbf16, #tpu.memory_space<vmem>>, %arg10: memref<1x512xf32, #tpu.memory_space<vmem>>, %arg11: memref<1x128x128xbf16, #tpu.memory_space<vmem>>, %arg12: memref<1x128x128xbf16, #tpu.memory_space<vmem>>, %arg13: memref<1x128x128xbf16, #tpu.memory_space<vmem>>, %arg14: memref<1x128x128xbf16, #tpu.memory_space<vmem>>) attributes {dimension_semantics = [#tpu.dimension_semantics<parallel>, #tpu.dimension_semantics<parallel>], iteration_bounds = array<i64: 2, 2>, scalar_prefetch = 0 : i64, scratch_operands = 0 : i64, tpu.core_type = #tpu.core_type<tc>, window_params = [{transform_indices = @transform_0, window_bounds = array<i64: 1, 128, 128>}, {transform_indices = @transform_1, window_bounds = array<i64: 1, 1, 128>}, {transform_indices = @transform_2, window_bounds = array<i64: 1, 1, 128>}, {transform_indices = @transform_3, window_bounds = array<i64: 1, 1, 1>}, {transform_indices = @transform_4, window_bounds = array<i64: 1, 1, 1>}, {pipeline_mode = #tpu.pipeline_mode<synchronous>, transform_indices = @transform_5, window_bounds = array<i64: 1, 128>}, {pipeline_mode = #tpu.pipeline_mode<synchronous>, transform_indices = @transform_6, window_bounds = array<i64: 1, 128>}, {pipeline_mode = #tpu.pipeline_mode<synchronous>, transform_indices = @transform_7, window_bounds = array<i64: 128, 512>}, {pipeline_mode = #tpu.pipeline_mode<synchronous>, transform_indices = @transform_8, window_bounds = array<i64: 1, 512>}, {transform_indices = @transform_9, window_bounds = array<i64: 1, 128, 128>}, {transform_indices = @transform_10, window_bounds = array<i64: 1, 128, 128>}, {transform_indices = @transform_11, window_bounds = array<i64: 1, 128, 128>}, {transform_indices = @transform_12, window_bounds = array<i64: 1, 128, 128>}]} {
    %c0 = arith.constant 0 : index
    %c0_0 = arith.constant 0 : index
    %c0_1 = arith.constant 0 : index
    %0 = vector.load %arg2[%c0, %c0_0, %c0_1] : memref<1x128x128xf32, #tpu.memory_space<vmem>>, vector<1x128x128xf32>
    %1 = vector.shape_cast %0 : vector<1x128x128xf32> to vector<128x128xf32>
    %c0_2 = arith.constant 0 : index
    %c0_3 = arith.constant 0 : index
    %2 = vector.load %arg7[%c0_2, %c0_3] : memref<1x128xf32, #tpu.memory_space<vmem>>, vector<1x128xf32>
    %c0_4 = arith.constant 0 : index
    %c0_5 = arith.constant 0 : index
    %3 = vector.load %arg8[%c0_4, %c0_5] : memref<1x128xf32, #tpu.memory_space<vmem>>, vector<1x128xf32>
    %cst = arith.constant dense<0.000000e+00> : vector<128xf32>
    %4 = vector.multi_reduction <add>, %1, %cst [1] : vector<128x128xf32> to vector<128xf32>
    %5 = vector.shape_cast %4 : vector<128xf32> to vector<128x1xf32>
    %cst_6 = arith.constant 1.280000e+02 : f32
    %6 = vector.broadcast %cst_6 : f32 to vector<128x1xf32>
    %7 = arith.divf %5, %6 : vector<128x1xf32>
    %8 = vector.broadcast %7 : vector<128x1xf32> to vector<128x128xf32>
    %9 = arith.subf %1, %8 : vector<128x128xf32>
    %10 = arith.mulf %9, %9 : vector<128x128xf32>
    %cst_7 = arith.constant dense<0.000000e+00> : vector<128xf32>
    %11 = vector.multi_reduction <add>, %10, %cst_7 [1] : vector<128x128xf32> to vector<128xf32>
    %12 = vector.shape_cast %11 : vector<128xf32> to vector<128x1xf32>
    %cst_8 = arith.constant 1.280000e+02 : f32
    %13 = vector.broadcast %cst_8 : f32 to vector<128x1xf32>
    %14 = arith.divf %12, %13 : vector<128x1xf32>
    %15 = vector.broadcast %7 : vector<128x1xf32> to vector<128x128xf32>
    %16 = arith.subf %1, %15 : vector<128x128xf32>
    %cst_9 = arith.constant 9.99999974E-6 : f32
    %17 = vector.broadcast %cst_9 : f32 to vector<128x1xf32>
    %18 = arith.addf %14, %17 : vector<128x1xf32>
    %19 = math.rsqrt %18 : vector<128x1xf32>
    %20 = vector.broadcast %19 : vector<128x1xf32> to vector<128x128xf32>
    %21 = arith.mulf %16, %20 : vector<128x128xf32>
    %22 = vector.broadcast %2 : vector<1x128xf32> to vector<128x128xf32>
    %23 = arith.mulf %21, %22 : vector<128x128xf32>
    %24 = vector.broadcast %3 : vector<1x128xf32> to vector<128x128xf32>
    %25 = arith.addf %23, %24 : vector<128x128xf32>
    %26 = arith.truncf %25 : vector<128x128xf32> to vector<128x128xbf16>
    %c0_10 = arith.constant 0 : index
    %c0_11 = arith.constant 0 : index
    %27 = vector.load %arg9[%c0_10, %c0_11] : memref<128x512xbf16, #tpu.memory_space<vmem>>, vector<128x512xbf16>
    %cst_12 = arith.constant dense<0.000000e+00> : vector<128x512xf32>
    %28 = tpu.matmul %26, %27, %cst_12 {dimension_numbers = #tpu.dot_dimension_numbers<[1], [0], [0], [1], [0, 0, 1, 1], [], []>} : vector<128x128xbf16>, vector<128x512xbf16>, vector<128x512xf32> -> vector<128x512xf32>
    %c0_13 = arith.constant 0 : index
    %c0_14 = arith.constant 0 : index
    %29 = vector.load %arg10[%c0_13, %c0_14] : memref<1x512xf32, #tpu.memory_space<vmem>>, vector<1x512xf32>
    %30 = vector.broadcast %29 : vector<1x512xf32> to vector<128x512xf32>
    %31 = arith.addf %28, %30 : vector<128x512xf32>
    %32 = vector.extract_strided_slice %31 {offsets = [0, 0], sizes = [128, 128], strides = [1, 1]} : vector<128x512xf32> to vector<128x128xf32>
    %33 = vector.extract_strided_slice %31 {offsets = [0, 128], sizes = [128, 128], strides = [1, 1]} : vector<128x512xf32> to vector<128x128xf32>
    %34 = vector.extract_strided_slice %31 {offsets = [0, 256], sizes = [128, 128], strides = [1, 1]} : vector<128x512xf32> to vector<128x128xf32>
    %35 = vector.extract_strided_slice %31 {offsets = [0, 384], sizes = [128, 1], strides = [1, 1]} : vector<128x512xf32> to vector<128x1xf32>
    %c0_15 = arith.constant 0 : index
    %c0_16 = arith.constant 0 : index
    %c0_17 = arith.constant 0 : index
    %36 = vector.load %arg5[%c0_15, %c0_16, %c0_17] : memref<1x1x1xf32, #tpu.memory_space<vmem>>, vector<1x1x1xf32>
    %37 = vector.shape_cast %36 : vector<1x1x1xf32> to vector<1x1xf32>
    %38 = vector.broadcast %37 : vector<1x1xf32> to vector<128x1xf32>
    %39 = arith.addf %35, %38 : vector<128x1xf32>
    %cst_18 = arith.constant 5.000000e-01 : f32
    %40 = vector.broadcast %cst_18 : f32 to vector<128x1xf32>
    %41 = arith.mulf %40, %39 : vector<128x1xf32>
    %42 = math.tanh %41 : vector<128x1xf32>
    %cst_19 = arith.constant 1.000000e+00 : f32
    %43 = vector.broadcast %cst_19 : f32 to vector<128x1xf32>
    %44 = arith.addf %42, %43 : vector<128x1xf32>
    %cst_20 = arith.constant 5.000000e-01 : f32
    %45 = vector.broadcast %cst_20 : f32 to vector<128x1xf32>
    %46 = arith.mulf %45, %44 : vector<128x1xf32>
    %47 = vector.extract_strided_slice %31 {offsets = [0, 385], sizes = [128, 1], strides = [1, 1]} : vector<128x512xf32> to vector<128x1xf32>
    %c0_21 = arith.constant 0 : index
    %c0_22 = arith.constant 0 : index
    %c0_23 = arith.constant 0 : index
    %48 = vector.load %arg6[%c0_21, %c0_22, %c0_23] : memref<1x1x1xf32, #tpu.memory_space<vmem>>, vector<1x1x1xf32>
    %49 = vector.shape_cast %48 : vector<1x1x1xf32> to vector<1x1xf32>
    %50 = vector.broadcast %49 : vector<1x1xf32> to vector<128x1xf32>
    %51 = arith.addf %47, %50 : vector<128x1xf32>
    %cst_24 = arith.constant 5.000000e-01 : f32
    %52 = vector.broadcast %cst_24 : f32 to vector<128x1xf32>
    %53 = arith.mulf %52, %51 : vector<128x1xf32>
    %54 = math.tanh %53 : vector<128x1xf32>
    %cst_25 = arith.constant 1.000000e+00 : f32
    %55 = vector.broadcast %cst_25 : f32 to vector<128x1xf32>
    %56 = arith.addf %54, %55 : vector<128x1xf32>
    %cst_26 = arith.constant 5.000000e-01 : f32
    %57 = vector.broadcast %cst_26 : f32 to vector<128x1xf32>
    %58 = arith.mulf %57, %56 : vector<128x1xf32>
    %c0_27 = arith.constant 0 : index
    %c0_28 = arith.constant 0 : index
    %c0_29 = arith.constant 0 : index
    %59 = vector.load %arg3[%c0_27, %c0_28, %c0_29] : memref<1x1x128xf32, #tpu.memory_space<vmem>>, vector<1x1x128xf32>
    %60 = vector.shape_cast %59 : vector<1x1x128xf32> to vector<1x128xf32>
    %c0_30 = arith.constant 0 : index
    %c0_31 = arith.constant 0 : index
    %c0_32 = arith.constant 0 : index
    %61 = vector.load %arg4[%c0_30, %c0_31, %c0_32] : memref<1x1x128xf32, #tpu.memory_space<vmem>>, vector<1x1x128xf32>
    %62 = vector.shape_cast %61 : vector<1x1x128xf32> to vector<1x128xf32>
    %cst_33 = arith.constant 1.000000e+00 : f32
    %63 = vector.broadcast %cst_33 : f32 to vector<128x1xf32>
    %64 = arith.subf %63, %46 : vector<128x1xf32>
    %65 = vector.broadcast %64 : vector<128x1xf32> to vector<128x128xf32>
    %66 = arith.mulf %65, %32 : vector<128x128xf32>
    %67 = vector.broadcast %46 : vector<128x1xf32> to vector<128x128xf32>
    %68 = vector.broadcast %60 : vector<1x128xf32> to vector<128x128xf32>
    %69 = arith.mulf %67, %68 : vector<128x128xf32>
    %70 = arith.addf %66, %69 : vector<128x128xf32>
    %cst_34 = arith.constant 0.0883883461 : f32
    %71 = vector.broadcast %cst_34 : f32 to vector<128x128xf32>
    %72 = arith.mulf %70, %71 : vector<128x128xf32>
    %cst_35 = arith.constant 1.000000e+00 : f32
    %73 = vector.broadcast %cst_35 : f32 to vector<128x1xf32>
    %74 = arith.subf %73, %58 : vector<128x1xf32>
    %75 = vector.broadcast %74 : vector<128x1xf32> to vector<128x128xf32>
    %76 = arith.mulf %75, %33 : vector<128x128xf32>
    %77 = vector.broadcast %58 : vector<128x1xf32> to vector<128x128xf32>
    %78 = vector.broadcast %62 : vector<1x128xf32> to vector<128x128xf32>
    %79 = arith.mulf %77, %78 : vector<128x128xf32>
    %80 = arith.addf %76, %79 : vector<128x128xf32>
    %81 = arith.truncf %25 : vector<128x128xf32> to vector<128x128xbf16>
    %c0_36 = arith.constant 0 : index
    %c0_37 = arith.constant 0 : index
    %c0_38 = arith.constant 0 : index
    %82 = vector.load %arg11[%c0_36, %c0_37, %c0_38] : memref<1x128x128xbf16, #tpu.memory_space<vmem>>, vector<1x128x128xbf16>
    %83 = vector.shape_cast %82 : vector<1x128x128xbf16> to vector<128x128xbf16>
    %84 = vector.shape_cast %81 : vector<128x128xbf16> to vector<1x128x128xbf16>
    tpu.vector_store %arg11[%c0_36, %c0_37, %c0_38], %84 {strides = array<i32>} : memref<1x128x128xbf16, #tpu.memory_space<vmem>>, vector<1x128x128xbf16>,
    %85 = arith.truncf %72 : vector<128x128xf32> to vector<128x128xbf16>
    %c0_39 = arith.constant 0 : index
    %c0_40 = arith.constant 0 : index
    %c0_41 = arith.constant 0 : index
    %86 = vector.load %arg12[%c0_39, %c0_40, %c0_41] : memref<1x128x128xbf16, #tpu.memory_space<vmem>>, vector<1x128x128xbf16>
    %87 = vector.shape_cast %86 : vector<1x128x128xbf16> to vector<128x128xbf16>
    %88 = vector.shape_cast %85 : vector<128x128xbf16> to vector<1x128x128xbf16>
    tpu.vector_store %arg12[%c0_39, %c0_40, %c0_41], %88 {strides = array<i32>} : memref<1x128x128xbf16, #tpu.memory_space<vmem>>, vector<1x128x128xbf16>,
    %89 = arith.truncf %80 : vector<128x128xf32> to vector<128x128xbf16>
    %c0_42 = arith.constant 0 : index
    %c0_43 = arith.constant 0 : index
    %c0_44 = arith.constant 0 : index
    %90 = vector.load %arg13[%c0_42, %c0_43, %c0_44] : memref<1x128x128xbf16, #tpu.memory_space<vmem>>, vector<1x128x128xbf16>
    %91 = vector.shape_cast %90 : vector<1x128x128xbf16> to vector<128x128xbf16>
    %92 = vector.shape_cast %89 : vector<128x128xbf16> to vector<1x128x128xbf16>
    tpu.vector_store %arg13[%c0_42, %c0_43, %c0_44], %92 {strides = array<i32>} : memref<1x128x128xbf16, #tpu.memory_space<vmem>>, vector<1x128x128xbf16>,
    %93 = arith.truncf %34 : vector<128x128xf32> to vector<128x128xbf16>
    %c0_45 = arith.constant 0 : index
    %c0_46 = arith.constant 0 : index
    %c0_47 = arith.constant 0 : index
    %94 = vector.load %arg14[%c0_45, %c0_46, %c0_47] : memref<1x128x128xbf16, #tpu.memory_space<vmem>>, vector<1x128x128xbf16>
    %95 = vector.shape_cast %94 : vector<1x128x128xbf16> to vector<128x128xbf16>
    %96 = vector.shape_cast %93 : vector<128x128xbf16> to vector<1x128x128xbf16>
    tpu.vector_store %arg14[%c0_45, %c0_46, %c0_47], %96 {strides = array<i32>} : memref<1x128x128xbf16, #tpu.memory_space<vmem>>, vector<1x128x128xbf16>,
    return
  }
  func.func @transform_0(%arg0: i32, %arg1: i32) -> (i32, i32, i32) {
    %c0_i32 = arith.constant 0 : i32
    %c0_i32_0 = arith.constant 0 : i32
    return %arg0, %arg1, %c0_i32 : i32, i32, i32
  }
  func.func @transform_1(%arg0: i32, %arg1: i32) -> (i32, i32, i32) {
    %c0_i32 = arith.constant 0 : i32
    %c0_i32_0 = arith.constant 0 : i32
    %c0_i32_1 = arith.constant 0 : i32
    return %arg0, %c0_i32, %c0_i32_0 : i32, i32, i32
  }
  func.func @transform_2(%arg0: i32, %arg1: i32) -> (i32, i32, i32) {
    %c0_i32 = arith.constant 0 : i32
    %c0_i32_0 = arith.constant 0 : i32
    %c0_i32_1 = arith.constant 0 : i32
    return %arg0, %c0_i32, %c0_i32_0 : i32, i32, i32
  }
  func.func @transform_3(%arg0: i32, %arg1: i32) -> (i32, i32, i32) {
    %c0_i32 = arith.constant 0 : i32
    %c0_i32_0 = arith.constant 0 : i32
    %c0_i32_1 = arith.constant 0 : i32
    return %arg0, %c0_i32, %c0_i32_0 : i32, i32, i32
  }
  func.func @transform_4(%arg0: i32, %arg1: i32) -> (i32, i32, i32) {
    %c0_i32 = arith.constant 0 : i32
    %c0_i32_0 = arith.constant 0 : i32
    %c0_i32_1 = arith.constant 0 : i32
    return %arg0, %c0_i32, %c0_i32_0 : i32, i32, i32
  }
  func.func @transform_5(%arg0: i32, %arg1: i32) -> (i32, i32) {
    %c0_i32 = arith.constant 0 : i32
    %c0_i32_0 = arith.constant 0 : i32
    %c0_i32_1 = arith.constant 0 : i32
    return %c0_i32, %c0_i32_0 : i32, i32
  }
  func.func @transform_6(%arg0: i32, %arg1: i32) -> (i32, i32) {
    %c0_i32 = arith.constant 0 : i32
    %c0_i32_0 = arith.constant 0 : i32
    %c0_i32_1 = arith.constant 0 : i32
    return %c0_i32, %c0_i32_0 : i32, i32
  }
  func.func @transform_7(%arg0: i32, %arg1: i32) -> (i32, i32) {
    %c0_i32 = arith.constant 0 : i32
    %c0_i32_0 = arith.constant 0 : i32
    %c0_i32_1 = arith.constant 0 : i32
    return %c0_i32, %c0_i32_0 : i32, i32
  }
  func.func @transform_8(%arg0: i32, %arg1: i32) -> (i32, i32) {
    %c0_i32 = arith.constant 0 : i32
    %c0_i32_0 = arith.constant 0 : i32
    %c0_i32_1 = arith.constant 0 : i32
    return %c0_i32, %c0_i32_0 : i32, i32
  }
  func.func @transform_9(%arg0: i32, %arg1: i32) -> (i32, i32, i32) {
    %c0_i32 = arith.constant 0 : i32
    %c0_i32_0 = arith.constant 0 : i32
    return %arg0, %arg1, %c0_i32 : i32, i32, i32
  }
  func.func @transform_10(%arg0: i32, %arg1: i32) -> (i32, i32, i32) {
    %c0_i32 = arith.constant 0 : i32
    %c0_i32_0 = arith.constant 0 : i32
    return %arg0, %arg1, %c0_i32 : i32, i32, i32
  }
  func.func @transform_11(%arg0: i32, %arg1: i32) -> (i32, i32, i32) {
    %c0_i32 = arith.constant 0 : i32
    %c0_i32_0 = arith.constant 0 : i32
    return %arg0, %arg1, %c0_i32 : i32, i32, i32
  }
  func.func @transform_12(%arg0: i32, %arg1: i32) -> (i32, i32, i32) {
    %c0_i32 = arith.constant 0 : i32
    %c0_i32_0 = arith.constant 0 : i32
    return %arg0, %arg1, %c0_i32 : i32, i32, i32
  }
}

</mosaic_0001>

<bundles_post_ra>
// kernel: tpu_custom_call.1
= control target key start
LH: loop header
LB: loop body
LE: loop exit
PB: predicated region body
PF: predicated region fallthrough
CT: control target
= control target key end

     0   :  { %s4957_s0 = inlined_call_operand.hbm [shape: f32[2,256,128], index: 0, kind: input, shape index: {}]   ;;  %s4958_s1 = inlined_call_operand.hbm [shape: f32[2,1,128], index: 1, kind: input, shape index: {}]   ;;  %s4959_s2 = inlined_call_operand.hbm [shape: f32[2,1,128], index: 2, kind: input, shape index: {}]   ;;  %s4960_s3 = inlined_call_operand.vmem [shape: f32[2,1,1], index: 3, kind: input, shape index: {}]   ;;  %s4961_s4 = inlined_call_operand.vmem [shape: f32[2,1,1], index: 4, kind: input, shape index: {}]   ;;  %s4962_s5 = inlined_call_operand.vmem [shape: f32[1,128], index: 5, kind: input, shape index: {}]   ;;  %s4963_s6 = inlined_call_operand.vmem [shape: f32[1,128], index: 6, kind: input, shape index: {}]   ;;  %s4964_s7 = inlined_call_operand.hbm [shape: bf16[128,512], index: 7, kind: input, shape index: {}]   ;;  %s4965_s8 = inlined_call_operand.vmem [shape: f32[1,512], index: 8, kind: input, shape index: {}]   ;;  %s4966_s9 = inlined_call_operand.hbm [shape: bf16[2,256,128], index: 9, kind: output, shape index: {0}]   ;;  %s4967_s10 = inlined_call_operand.hbm [shape: bf16[2,256,128], index: 10, kind: output, shape index: {1}]   ;;  %s4968_s11 = inlined_call_operand.hbm [shape: bf16[2,256,128], index: 11, kind: output, shape index: {2}]   ;;  %s4969_s12 = inlined_call_operand.hbm [shape: bf16[2,256,128], index: 12, kind: output, shape index: {3}]  }
   0x1   :  { %4991 = sst [smem:[#allocation33_spill]] %s4958_s1 }
   0x2   :  { %4992 = sst [smem:[#allocation34_spill]] %s4960_s3 }
   0x3   :  { %4993 = sst [smem:[#allocation35_spill]] %s4961_s4 }
   0x4   :  { %4994 = sst [smem:[#allocation36_spill]] %s4962_s5 }
   0x5   :  { %4995 = sst [smem:[#allocation37_spill]] %s4963_s6 }
   0x6   :  { %4996 = sst [smem:[#allocation38_spill]] %s4964_s7 }
   0x7   :  { %4997 = sst [smem:[#allocation39_spill]] %s4965_s8 }
   0x8   :  { %4998 = sst [smem:[#allocation40_spill]] %s4966_s9 }
   0x9   :  { %4999 = sst [smem:[#allocation41_spill]] %s4967_s10 }
   0xa   :  { %5000 = sst [smem:[#allocation42_spill]] %s4968_s11 }
   0xb   :  { %5001 = sst [smem:[#allocation43_spill]] %s4969_s12 }
   0xc   :  { %18 = vsyncpa [#allocation3], 0 }
   0xd   :  { %20 = vsyncpa [#allocation3 + $0x1], 0 }
   0xe   :  { %21 = vsyncpa [#allocation6], 0 }
   0xf   :  { %23 = vsyncpa [#allocation6 + $0x1], 0 }
  0x10   :  { %24 = vsyncpa [#allocation9], 0 }
  0x11   :  { %25 = vsyncpa [#allocation4], 0 }
  0x12   :  { %27 = vsyncpa [#allocation4 + $0x1], 0 }
  0x13   :  { %28 = vsyncpa [#allocation12], 0 }
  0x14   :  { %30 = vsyncpa [#allocation12 + $0x1], 0 }
  0x15   :  { %31 = vsyncpa [#allocation15], 0 }
  0x16   :  { %33 = vsyncpa [#allocation15 + $0x1], 0  ;;  %s3663_s21 = smov 0   ;;  %s3665_s22 = smov 0  }
  0x17   :  { %s3667_s23 = smov 0   ;;  %s3669_s24 = smov 0  }
  0x18   :  { %s3671_s25 = smov 0   ;;  %s3673_s26 = smov 0  }
  0x19   :  { %s3675_s27 = smov 0   ;;  %s3677_s28 = smov 0  }
  0x1a   :  { %s3679_s29 = smov 0   ;;  %s3681_s30 = smov 0  }
  0x1b   :  { %s3683_s13 = smov 0  }
  0x1c LB: > { %5002 = sst [smem:[#allocation22_spill]] %s3557_s24  ;;  %s3717_s14 = sadd.s32 4294967295, %s3585_s13   ;;  %s3585_s13 = sphi %s3683_s13, %s39_s13   ;;  %s3581_s30 = sphi %s3681_s30, %s5090_s30   ;;  %s3577_s29 = sphi %s3679_s29, %s5081_s29   ;;  %s3573_s28 = sphi %s3677_s28, %s5089_s28   ;;  %s3569_s27 = sphi %s3675_s27, %s5080_s27   ;;  %s3565_s26 = sphi %s3673_s26, %s5088_s26   ;;  %s3561_s25 = sphi %s3671_s25, %s5087_s25   ;;  %s3557_s24 = sphi %s3669_s24, %s5086_s24   ;;  %s3553_s23 = sphi %s3667_s23, %s5085_s23   ;;  %s3549_s22 = sphi %s3665_s22, %s5084_s22   ;;  %s3545_s21 = sphi %s3663_s21, %s5083_s21  }
  0x1d   : > { %5003 = sst [smem:[#allocation23_spill]] %s3569_s27  ;;  %s4973_s15 = sadd.s32 4294967294, %s3585_s13  }
  0x1e   : > { %5004 = sst [smem:[#allocation24_spill]] %s3573_s28  ;;  %p67_p0 = scmp.ne.s32.totalorder %s3565_s26, %s3561_s25 }
  0x1f   : > { %5005 = sst [smem:[#allocation25_spill]] %s3577_s29  ;;  %p68_p1 = scmp.eq.s32.totalorder %s3585_s13, 0 }
  0x20   : > { %5006 = sst [smem:[#allocation26_spill]] %s3585_s13  ;;  %p73_p2 = scmp.ne.s32.totalorder %s3561_s25, %s3557_s24 }
  0x21   : > { %p74_p3 = scmp.eq.s32.totalorder %s3717_s14, 0  ;;  %p3731_p4 = por %p68_p1, %p67_p0 }
  0x22   : > { %p93_p5 = scmp.ne.s32.totalorder %s3553_s23, %s3549_s22  ;;  %p99_p7 = scmp.ne.s32.totalorder %s3549_s22, %s3545_s21 }
  0x23   : > { %p3739_p6 = por %p74_p3, %p73_p2  ;;  %p287_p9 = scmp.eq.s32.totalorder %s3717_s14, 3 }
  0x24   : > { %p3744_p8 = por %p93_p5, %p68_p1  ;;  %p3751_p10 = por %p99_p7, %p74_p3 }
  0x25   : > { %p293_p11 = scmp.eq.s32.totalorder %s4973_s15, 3  ;;  %p3760_p12 = por %p287_p9, %p67_p0 }
  0x26   : > { %s5010_s17 = scalar_select %p3751_p10, 1, 0 }
  0x27   : > { %s5012_s16 = scalar_select %p3760_p12, 1, 0 }
  0x28   : > { %5011 = sst [smem:[#allocation27_spill]] %s5010_s17  ;;  %p3764_p13 = por %p293_p11, %p73_p2 }
  0x29   : > { %5013 = sst [smem:[#allocation28_spill]] %s5012_s16  ;;  %p2978_p1 = scmp.lt.s32.totalorder %s3585_s13, 4 }
  0x2a   : > { %s5014_s21 = scalar_select %p3764_p13, 1, 0 }
  0x2b   : > { %s444_s24 = sand.u32 1, %s3585_s13   ;;  %s4979_s11 = sand.u32 1, %s3553_s23  }
  0x2c   : > { %5015 = sst [smem:[#allocation29_spill]] %s5014_s21  ;;  %p3773_p5 = pnand %p2978_p1, %p3731_p4 }
  0x2d   : > { %s5017_s1 = sld [smem:[#allocation33_spill]]  ;;  %s447_s27 = scalar_lea.vmem [#allocation5], %s4979_s11 }
  0x2e   : > { %s454_s16 = sshll.u32 %s447_s27, 4  ;;  %p3785_p0 = pnand %p2978_p1, %p3744_p8  ;;  %s455_s16 = int_to_ptr.vmem [resolvable:$true] %s454_s16 }
  0x2f   : > { %s3789_s21 = scalar_lea.sflag [#allocation6], %s444_s24  ;;  %p2552_p2 = scmp.ge.s32.totalorder %s3585_s13, 1 }
  0x30   : > { %p384_p4 = scmp.lt.s32.totalorder %s3585_s13, 5  ;;  %s5019_s7 = sld [smem:[#allocation38_spill]] }
  0x31   : > { %s3587_s24 = smov [#allocation8]   ;;  %s420_s12 = sand.u32 1, %s3565_s26  }
  0x32   : > { %p3799_p7 = pnand %p2552_p2, %p384_p4  ;;  %s403_s20 = sshll.u32 %s3587_s24, 4  ;;  %s404_s20 = int_to_ptr.vmem [resolvable:$true] %s403_s20 }
  0x33   : > { %s450_s9 = scalar_lea.hbm %s5017_s1, %s3581_s30  ;;  %s3589_s11 = smov 16  }
  0x34   : > { %s452_s8 = sshll.u32 %s450_s9, 4  ;;  %p2950_p8 = pneg %p3799_p7  ;;  %s453_s8 = int_to_ptr.hbm [resolvable:$true] %s452_s8 }
  0x35   : > { %2960 = dma.hbm_to_vmem [thread:$0]  (!%p3785_p0), %s453_s8, 16, %s455_s16, %s3789_s21  }
  0x36   : > { %s401_s27 = sshll.u32 %s5019_s7, 4  ;;  %s60_s8 = sadd.s32 1, %s3565_s26  ;;  %s402_s27 = int_to_ptr.hbm [resolvable:$true] %s401_s27 }
  0x37   : > { %p2951_p9 = pnand %p2950_p8, %p74_p3  ;;  %s48_s16 = sadd.s32 1, %s3577_s29 }
  0x38   : > { %p49_p11 = scmp.ge.s32.totalorder %s48_s16, 2  ;;  %s3588_s9 = smov 256  }
  0x39   : > { %2953 = dma.hbm_to_vmem [thread:$0]  (!%p2951_p9), %s402_s27, 4096, %s404_s20, [#allocation9], %s3588_s9, %s3588_s9, %s3589_s11  }
  0x3a   : > { %s5092_s16 = smov (%p49_p11, %s48_s16), 0  ;;  %s5022_s1 = sadd.s32 1, %s3581_s30 }
  0x3b   : > { %5021 = sst [smem:[#allocation30_spill]] %s5092_s16  ;;  %s5094_s1 = smov (!%p49_p11, %s5022_s1), %s3581_s30 }
  0x3c   : > { %s56_s24 = ssub.s32 %s3577_s29, %s5092_s16  ;;  %p53_p1 = scmp.ge.s32.totalorder %s5094_s1, 2 }
  0x3d   : > { %s2555_s7 = sshll.u32 %s420_s12, 7  ;;  %s2556_s13 = sshll.u32 %s3577_s29, 4 }
  0x3e   : > { %s5096_s1 = smov (%p53_p1, %s5094_s1), 0  ;;  %s2557_s6 = sshll.u32 %s3581_s30, 5 }
  0x3f   : > { %5023 = sst [smem:[#allocation31_spill]] %s5096_s1  ;;  %s424_s5 = scalar_lea.vmem [#allocation2], %s2555_s7 }
  0x40   : > { %s434_s4 = sshll.u32 %s424_s5, 4  ;;  %s55_s11 = ssub.s32 %s3581_s30, %s5096_s1  ;;  %s435_s4 = int_to_ptr.vmem [resolvable:$true] %s434_s4 }
  0x41   : > { %s429_s27 = sadd.s32 %s2557_s6, %s2556_s13  ;;  %s57_s20 = sor.u32 %s56_s24, %s55_s11 }
  0x42   : > { %p84_p2 = scmp.eq.s32.totalorder %s55_s11, 0  ;;  %p58_p4 = scmp.eq.s32.totalorder %s57_s20, 0 }
  0x43   : > { %s2558_s9 = sshll.u32 %s429_s27, 3  ;;  %s5024_s3 = sadd.s32 1, %s3553_s23 }
  0x44   : > { %s3826_s16 = scalar_select %p84_p2, %s3553_s23, %s5024_s3  }
  0x45   : > { %s3829_s29 = scalar_select %p58_p4, %s3565_s26, %s60_s8  }
  0x46   : > { %s431_s5 = scalar_lea.hbm %s4957_s0, %s2558_s9  ;;  %s421_s6 = scalar_lea.sflag [#allocation3], %s420_s12 }
  0x47   : > { %5025 = sst [smem:[#allocation32_spill]] %s3829_s29  ;;  %s432_s7 = sshll.u32 %s431_s5, 4  ;;  %s433_s7 = int_to_ptr.hbm [resolvable:$true] %s432_s7 }
  0x48   : > { %s3590_s13 = smov 128   ;;  %s3591_s24 = smov 8  }
  0x49   : > { %2957 = dma.hbm_to_vmem [thread:$0]  (!%p3773_p5), %s433_s7, 2048, %s435_s4, %s421_s6, %s3590_s13, %s3590_s13, %s3591_s24  }
  0x4a   : > { %s467_s3 = scalar_lea.hbm %s4959_s2, %s3581_s30  ;;  %s5026_s20 = sand.u32 1, %s3553_s23  }
  0x4b   : > { %s464_s1 = scalar_lea.vmem [#allocation7], %s5026_s20  ;;  %s469_s29 = sshll.u32 %s467_s3, 4  ;;  %s470_s29 = int_to_ptr.hbm [resolvable:$true] %s469_s29 }
  0x4c   : > { %s471_s8 = sshll.u32 %s464_s1, 4  ;;  %492 = sbr.rel (%p3799_p7) target bundleno = 866 (0x362), region = 56  ;;  %s472_s8 = int_to_ptr.vmem [resolvable:$true] %s471_s8 }
  0x4d   : > { %2963 = dma.hbm_to_vmem [thread:$0]  (!%p3785_p0), %s470_s29, 16, %s472_s8, %s3789_s21  }
  0x4e   : > { %s3848_s28 = sand.u32 (!%p3799_p7), 1, %s3561_s25  }
  0x4f   : > { %s2560_s4 = sshll.u32 (!%p3799_p7), %s3848_s28, 7  ;;  %s495_s10 = scalar_lea.sflag (!%p3799_p7), [#allocation3], %s3848_s28 }
  0x50   : > { %s3852_s17 = scalar_lea.vmem (!%p3799_p7), [#allocation2], %s2560_s4 }
  0x51   : > { %3520 = dma.done.wait (%p3739_p6), %s495_s10, 2048  }
  0x52   : > { %3522 = vsyncadd (%p3739_p6), %s495_s10, 4294965248  ;;  %s4990_s29 = sand.u32 1, %s3717_s14   ;;  %s506_s21 = sand.u32 1, %s3549_s22  }
  0x53   : > { %s505_s18 = scalar_lea.sflag [#allocation6], %s4990_s29  ;;  %s3862_s15 = scalar_lea.vmem [#allocation5], %s506_s21 }
  0x54   : > { %3524 = dma.done.wait (%p3751_p10), %s505_s18, 32  }
  0x55   : > { %3526 = vsyncadd (%p3751_p10), %s505_s18, 4294967264  ;;  %s3868_s12 = scalar_lea.vmem [#allocation7], %s506_s21 }
  0x56   : > { %3528 = dma.done.wait (%p74_p3), [#allocation9], 4096  }
  0x57   : > { %3530 = vsyncadd (%p74_p3), [#allocation9], 4294963200  ;;  %v3875_v0 = vld [vmem:[%s3852_s17 + $0x20] sm:$0xff]  ;;  %v605_v1 = vld [vmem:[%s3852_s17 + $0x10] sm:$0xff]  ;;  %v3592_v16 = vmov 128.0   ;;  %s5028_s19 = sld [smem:[#allocation24_spill]] }
  0x58   : > { %v603_v2 = vld [vmem:[%s3852_s17] sm:$0xff]  ;;  %629 = vadd.xlane.f32.xlu2 %v3875_v0  ;;  %625 = vadd.xlane.f32.xlu1 %v605_v1  ;;  %v608_v3 = vld [vmem:[%s3852_s17 + $0x28] sm:$0xff]  ;;  %v606_v4 = vld [vmem:[%s3852_s17 + $0x18] sm:$0xff]  ;;  %3145 = vrcp.f32 %v3592_v16  ;;  %s5029_s6 = sld [smem:[#allocation34_spill]]  ;;  %s4336_s18 = sshll.u32 %s3848_s28, 6 }
  0x59   : > { %621 = vadd.xlane.f32.xlu0 %v603_v2  ;;  %v604_v5 = vld [vmem:[%s3852_s17 + $0x8] sm:$0xff]  ;;  %v611_v6 = vld [vmem:[%s3852_s17 + $0x40] sm:$0xff]  ;;  %v3885_v7 = vld [vmem:[%s3852_s17 + $0x38] sm:$0xff]  ;;  %s5030_s27 = sld [smem:[#allocation35_spill]]  ;;  %s4391_s5 = scalar_lea.vmem [#allocation10], %s4336_s18 }
  0x5a   : > { %v609_v8 = vld [vmem:[%s3852_s17 + $0x30] sm:$0xff]  ;;  %v3890_v9 = vld [vmem:[%s3852_s17 + $0x58] sm:$0xff]  ;;  %v3896_v11 = vld [vmem:[%s3852_s17 + $0x48] sm:$0xff]  ;;  %s5034_s10 = sld [smem:[#allocation36_spill]]  ;;  %s3593_s11 = smov 1  }
  0x5b   : > { %v3893_v10 = vld [vmem:[%s3852_s17 + $0x50] sm:$0xff]  ;;  %v3905_v13 = vld [vmem:[%s3852_s17 + $0x68] sm:$0xff]  ;;  %v3908_v14 = vld [vmem:[%s3852_s17 + $0x60] sm:$0xff]  ;;  %s5035_s21 = sld [smem:[#allocation37_spill]]  ;;  %s2232_s4 = sshll.u32 %s4391_s5, 4  ;;  %s2233_s4 = int_to_ptr.vmem [resolvable:$true] %s2232_s4 }
  0x5c   : > { %v3902_v12 = vld [vmem:[%s3852_s17 + $0x70] sm:$0xff]  ;;  %v3914_v15 = vld [vmem:[%s3852_s17 + $0x78] sm:$0xff]  ;;  %s5064_s8 = sld [smem:[#allocation39_spill]] }
  0x5d   : > { %p593_p3 = scmp.lt.s32.totalorder %s5028_s19, 1  ;;  %s2699_s1 = sshll.u32 %s5028_s19, 5 }
  0x5e   : > { %v3146_v17 = vpop.eup %3145 }
  0x5f   : > { %v654_v18 = vmul.f32 128.0, %v3146_v17  ;;  %vm658_vm0 = vweird.f32 %v3146_v17  ;;  %s4010_s9 = scalar_select %p593_p3, %s5028_s19, 1 }
  0x60   : > { %631 = vadd.xlane.f32.xlu2 %v608_v3  ;;  %627 = vadd.xlane.f32.xlu1 %v606_v4 }
  0x61   : > { %623 = vadd.xlane.f32.xlu0 %v604_v5  ;;  %v655_v19 = vsub.f32 1.0, %v654_v18  ;;  %s595_s13 = scalar_lea.vmem %s5029_s6, %s4010_s9  ;;  %s598_s20 = scalar_lea.vmem %s5030_s27, %s4010_s9 }
  0x62   : > { %s4526_s9 = scalar_lea.vmem [#allocation14], %s4336_s18  ;;  %s5066_s27 = sld [smem:[#allocation40_spill]] }
  0x63   : > { %v656_v20 = vmul.f32 %v3146_v17, %v655_v19  ;;  %s2289_s7 = sshll.u32 %s4526_s9, 4  ;;  %s4804_s7 = int_to_ptr.vmem [resolvable:$true] %s2289_s7 }
  0x65   : > { %v657_v21 = vadd.f32 %v3146_v17, %v656_v20 }
  0x67   : > { %v3917_v22 = vsel %vm658_vm0, %v3146_v17, %v657_v21 }
  0x68   : > { %637 = vadd.xlane.f32.xlu2 %v611_v6  ;;  %635 = vadd.xlane.f32.xlu1 %v3885_v7 }
  0x69   : > { %633 = vadd.xlane.f32.xlu0 %v609_v8 }
  0x70   : > { %643 = vadd.xlane.f32.xlu2 %v3890_v9  ;;  %641 = vadd.xlane.f32.xlu1 %v3893_v10 }
  0x71   : > { %639 = vadd.xlane.f32.xlu0 %v3896_v11 }
  0x78   : > { %649 = vadd.xlane.f32.xlu2 %v3902_v12  ;;  %647 = vadd.xlane.f32.xlu1 %v3905_v13 }
  0x79   : > { %645 = vadd.xlane.f32.xlu0 %v3908_v14 }
  0x81   : > { %651 = vadd.xlane.f32.xlu0 %v3914_v15 }
  0xcb   : > { %v630_v23 = vpop.xlane.xlu2 %629  ;;  %v626_v24 = vpop.xlane.xlu1 %625 }
  0xcc   : > { %v662_v25 = vmul.f32 %v3917_v22, %v626_v24  ;;  %v622_v26 = vpop.xlane.xlu0 %621  ;;  %v664_v40 = vmul.f32 %v3917_v22, %v630_v23 }
  0xcd   : > { %v660_v27 = vmul.f32 %v3917_v22, %v622_v26  ;;  %v2740_v26 = vld [vmem:[#allocation8 + $0xe4] sm:$0xf] }
  0xce   : > { %v3921_v28 = vsub.f32 %v605_v1, %v662_v25  ;;  %v3946_v45 = vsub.f32 %v3875_v0, %v664_v40  ;;  %v2664_v40 = vld [vmem:[#allocation8 + $0xc0] sm:$0xf] }
  0xcf   : > { %v3923_v29 = vsub.f32 %v603_v2, %v660_v27 }
  0xd0   : > { %v694_v30 = vmul.f32 %v3921_v28, %v3921_v28  ;;  %v696_v53 = vmul.f32 %v3946_v45, %v3946_v45 }
  0xd1   : > { %v692_v31 = vmul.f32 %v3923_v29, %v3923_v29 }
  0xd2   : > { %712 = vadd.xlane.f32.xlu0 %v694_v30  ;;  %v2682_v30 = vld [vmem:[#allocation8 + $0xf0] sm:$0xf0] }
  0xd3   : > { %708 = vadd.xlane.f32.xlu1 %v692_v31  ;;  %v632_v32 = vpop.xlane.xlu2 %631  ;;  %v628_v33 = vpop.xlane.xlu1 %627  ;;  %v2688_v31 = vld [vmem:[#allocation8 + $0xe8] sm:$0xf] }
  0xd4   : > { %v665_v34 = vmul.f32 %v3917_v22, %v632_v32  ;;  %v663_v35 = vmul.f32 %v3917_v22, %v628_v33  ;;  %v624_v36 = vpop.xlane.xlu0 %623  ;;  %v2743_v32 = vld [vmem:[#allocation8 + $0xf4] sm:$0xf0]  ;;  %v2685_v33 = vor.u32 %v2740_v26, %v2682_v30 }
  0xd5   : > { %v661_v37 = vmul.f32 %v3917_v22, %v624_v36  ;;  %v2690_v36 = vld [vmem:[#allocation8 + $0xf8] sm:$0xf0] }
  0xd6   : > { %v3932_v38 = vsub.f32 %v608_v3, %v665_v34  ;;  %v3934_v39 = vsub.f32 %v606_v4, %v663_v35  ;;  %v2689_v34 = vor.u32 %v2743_v32, %v2688_v31  ;;  %v2741_v35 = vld [vmem:[#allocation8 + $0xec] sm:$0xf]  ;;  %1301 = vmatpush.bf16.msra.mxu1 %v2685_v33  ;;  %v2616_v32 = vld [vmem:[#allocation8 + $0x60] sm:$0xf]  ;;  %v2726_v33 = vld [vmem:[#allocation8 + $0x6c] sm:$0xf0] }
  0xd7   : > { %v3937_v41 = vsub.f32 %v604_v5, %v661_v37  ;;  %v2693_v37 = vor.u32 %v2741_v35, %v2690_v36  ;;  %v2617_v35 = vor.u32 %v2726_v33, %v2616_v32  ;;  %v2724_v36 = vld [vmem:[#allocation8 + $0x64] sm:$0xf] }
  0xd8   : > { %v697_v42 = vmul.f32 %v3932_v38, %v3932_v38  ;;  %v695_v43 = vmul.f32 %v3934_v39, %v3934_v39  ;;  %1350 = vmatpush.bf16.msra.mxu2 %v2689_v34 }
  0xd9   : > { %v693_v44 = vmul.f32 %v3937_v41, %v3937_v41  ;;  %1399 = vmatpush.bf16.msra.mxu3 %v2693_v37  ;;  %v2618_v37 = vld [vmem:[#allocation8 + $0x70] sm:$0xf0] }
  0xda   : > { %718 = vadd.xlane.f32.xlu0 %v697_v42  ;;  %v2738_v42 = vld [vmem:[#allocation8 + $0xcc] sm:$0xf0] }
  0xdb   : > { %714 = vadd.xlane.f32.xlu1 %v695_v43  ;;  %710 = vadd.xlane.f32.xlu2 %v693_v44  ;;  %v638_v46 = vpop.xlane.xlu2 %637  ;;  %v636_v47 = vpop.xlane.xlu1 %635  ;;  %v2736_v43 = vld [vmem:[#allocation8 + $0xc4] sm:$0xf]  ;;  %v2665_v44 = vor.u32 %v2738_v42, %v2664_v40  ;;  %v2621_v40 = vor.u32 %v2724_v36, %v2618_v37  ;;  %v2624_v42 = vld [vmem:[#allocation8 + $0x68] sm:$0xf]  ;;  %v2594_v36 = vld [vmem:[#allocation8 + $0x38] sm:$0xf0] }
  0xdc   : > { %v668_v48 = vmul.f32 %v3917_v22, %v638_v46  ;;  %v634_v49 = vpop.xlane.xlu0 %633  ;;  %v667_v54 = vmul.f32 %v3917_v22, %v636_v47  ;;  %v2666_v46 = vld [vmem:[#allocation8 + $0xd0] sm:$0xf0]  ;;  %v2672_v47 = vld [vmem:[#allocation8 + $0xc8] sm:$0xf]  ;;  %v2568_v37 = vld [vmem:[#allocation8] sm:$0xf] }
  0xdd   : > { %v666_v50 = vmul.f32 %v3917_v22, %v634_v49  ;;  %v2669_v49 = vor.u32 %v2736_v43, %v2666_v46  ;;  %v2727_v43 = vld [vmem:[#allocation8 + $0x74] sm:$0xf0] }
  0xde   : > { %v3950_v51 = vsub.f32 %v611_v6, %v668_v48  ;;  %v3962_v58 = vsub.f32 %v3885_v7, %v667_v54  ;;  %v2739_v48 = vld [vmem:[#allocation8 + $0xd4] sm:$0xf0]  ;;  %v2674_v54 = vld [vmem:[#allocation8 + $0xd8] sm:$0xf0]  ;;  %v2625_v46 = vor.u32 %v2727_v43, %v2624_v42 }
  0xdf   : > { %v3952_v52 = vsub.f32 %v609_v8, %v666_v50  ;;  %v2673_v50 = vor.u32 %v2739_v48, %v2672_v47  ;;  %1302 = vmatpush.bf16.msra.mxu1 %v2669_v49  ;;  %v2626_v47 = vld [vmem:[#allocation8 + $0x78] sm:$0xf0]  ;;  %v2600_v49 = vld [vmem:[#allocation8 + $0x40] sm:$0xf] }
  0xe0   : > { %v700_v55 = vmul.f32 %v3950_v51, %v3950_v51  ;;  %v699_v1 = vmul.f32 %v3962_v58, %v3962_v58 }
  0xe1   : > { %v698_v56 = vmul.f32 %v3952_v52, %v3952_v52  ;;  %1351 = vmatpush.bf16.msra.mxu2 %v2673_v50  ;;  %v2722_v50 = vld [vmem:[#allocation8 + $0x4c] sm:$0xf0] }
  0xe2   : > { %724 = vadd.xlane.f32.xlu0 %v700_v55 }
  0xe3   : > { %716 = vadd.xlane.f32.xlu2 %v696_v53  ;;  %720 = vadd.xlane.f32.xlu1 %v698_v56  ;;  %v644_v57 = vpop.xlane.xlu2 %643  ;;  %v642_v59 = vpop.xlane.xlu1 %641  ;;  %v2737_v53 = vld [vmem:[#allocation8 + $0xcc] sm:$0xf]  ;;  %v2648_v56 = vld [vmem:[#allocation8 + $0xa0] sm:$0xf] }
  0xe4   : > { %v671_v60 = vmul.f32 %v3917_v22, %v644_v57  ;;  %v640_v61 = vpop.xlane.xlu0 %639  ;;  %v670_v2 = vmul.f32 %v3917_v22, %v642_v59  ;;  %v2677_v55 = vor.u32 %v2737_v53, %v2674_v54  ;;  %v2734_v57 = vld [vmem:[#allocation8 + $0xac] sm:$0xf0]  ;;  %v2732_v59 = vld [vmem:[#allocation8 + $0xa4] sm:$0xf] }
  0xe5   : > { %v669_v62 = vmul.f32 %v3917_v22, %v640_v61  ;;  %v2650_v61 = vld [vmem:[#allocation8 + $0xb0] sm:$0xf0]  ;;  %v2720_v53 = vld [vmem:[#allocation8 + $0x44] sm:$0xf] }
  0xe6   : > { %v3967_v63 = vsub.f32 %v3890_v9, %v671_v60  ;;  %v3980_v6 = vsub.f32 %v3893_v10, %v670_v2  ;;  %1400 = vmatpush.bf16.msra.mxu3 %v2677_v55  ;;  %v2649_v60 = vor.u32 %v2734_v57, %v2648_v56  ;;  %v2653_v2 = vor.u32 %v2732_v59, %v2650_v61  ;;  %v2602_v56 = vld [vmem:[#allocation8 + $0x50] sm:$0xf0]  ;;  %v2608_v57 = vld [vmem:[#allocation8 + $0x48] sm:$0xf]  ;;  %v2723_v59 = vld [vmem:[#allocation8 + $0x54] sm:$0xf0] }
  0xe7   : > { %v3970_v0 = vsub.f32 %v3896_v11, %v669_v62  ;;  %v2656_v62 = vld [vmem:[#allocation8 + $0xa8] sm:$0xf]  ;;  %v2601_v55 = vor.u32 %v2722_v50, %v2600_v49 }
  0xe8   : > { %v703_v3 = vmul.f32 %v3967_v63, %v3967_v63  ;;  %v702_v18 = vmul.f32 %v3980_v6, %v3980_v6  ;;  %1303 = vmatpush.bf16.msra.mxu1 %v2653_v2  ;;  %v2609_v2 = vor.u32 %v2723_v59, %v2608_v57  ;;  %v2576_v57 = vld [vmem:[#allocation8 + $0x8] sm:$0xf]  ;;  %v2715_v59 = vld [vmem:[#allocation8 + $0x14] sm:$0xf0] }
  0xe9   : > { %v701_v4 = vmul.f32 %v3970_v0, %v3970_v0 }
  0xea   : > { %730 = vadd.xlane.f32.xlu0 %v703_v3 }
  0xeb   : > { %722 = vadd.xlane.f32.xlu2 %v699_v1  ;;  %726 = vadd.xlane.f32.xlu1 %v701_v4  ;;  %v650_v5 = vpop.xlane.xlu2 %649  ;;  %v648_v9 = vpop.xlane.xlu1 %647  ;;  %v2735_v1 = vld [vmem:[#allocation8 + $0xb4] sm:$0xf0]  ;;  %v2733_v4 = vld [vmem:[#allocation8 + $0xac] sm:$0xf] }
  0xec   : > { %v674_v7 = vmul.f32 %v3917_v22, %v650_v5  ;;  %v646_v8 = vpop.xlane.xlu0 %645  ;;  %v673_v10 = vmul.f32 %v3917_v22, %v648_v9  ;;  %v2657_v3 = vor.u32 %v2735_v1, %v2656_v62  ;;  %v2658_v5 = vld [vmem:[#allocation8 + $0xb8] sm:$0xf0]  ;;  %v2730_v9 = vld [vmem:[#allocation8 + $0x8c] sm:$0xf0]  ;;  %v2605_v1 = vor.u32 %v2720_v53, %v2602_v56 }
  0xed   : > { %v672_v11 = vmul.f32 %v3917_v22, %v646_v8  ;;  %v2632_v8 = vld [vmem:[#allocation8 + $0x80] sm:$0xf] }
  0xee   : > { %v3985_v16 = vsub.f32 %v3902_v12, %v674_v7  ;;  %v3998_v12 = vsub.f32 %v3905_v13, %v673_v10  ;;  %v2680_v13 = vld [vmem:[#allocation8 + $0xe0] sm:$0xf]  ;;  %v2661_v7 = vor.u32 %v2733_v4, %v2658_v5  ;;  %1352 = vmatpush.bf16.msra.mxu2 %v2657_v3  ;;  %v2634_v10 = vld [vmem:[#allocation8 + $0x90] sm:$0xf0]  ;;  %v2721_v3 = vld [vmem:[#allocation8 + $0x4c] sm:$0xf] }
  0xef   : > { %v3988_v17 = vsub.f32 %v3908_v14, %v672_v11  ;;  %v2728_v11 = vld [vmem:[#allocation8 + $0x84] sm:$0xf]  ;;  %v2610_v4 = vld [vmem:[#allocation8 + $0x58] sm:$0xf0] }
  0xf0   : > { %v706_v19 = vmul.f32 %v3985_v16, %v3985_v16  ;;  %v705_v24 = vmul.f32 %v3998_v12, %v3998_v12  ;;  %1401 = vmatpush.bf16.msra.mxu3 %v2661_v7 }
  0xf1   : > { %v704_v20 = vmul.f32 %v3988_v17, %v3988_v17 }
  0xf2   : > { %736 = vadd.xlane.f32.xlu0 %v706_v19  ;;  %v2640_v19 = vld [vmem:[#allocation8 + $0x88] sm:$0xf] }
  0xf3   : > { %728 = vadd.xlane.f32.xlu2 %v702_v18  ;;  %732 = vadd.xlane.f32.xlu1 %v704_v20  ;;  %v2633_v18 = vor.u32 %v2730_v9, %v2632_v8  ;;  %v2731_v20 = vld [vmem:[#allocation8 + $0x94] sm:$0xf0]  ;;  %v2613_v8 = vor.u32 %v2721_v3, %v2610_v4  ;;  %v2578_v3 = vld [vmem:[#allocation8 + $0x18] sm:$0xf0] }
  0xf4   : > { %v652_v14 = vpop.xlane.xlu0 %651 }
  0xf5   : > { %v675_v21 = vmul.f32 %v3917_v22, %v652_v14  ;;  %v2637_v14 = vor.u32 %v2728_v11, %v2634_v10  ;;  %v2718_v10 = vld [vmem:[#allocation8 + $0x2c] sm:$0xf0] }
  0xf7   : > { %v4002_v23 = vsub.f32 %v3914_v15, %v675_v21  ;;  %v2742_v15 = vld [vmem:[#allocation8 + $0xec] sm:$0xf0]  ;;  %v2641_v21 = vor.u32 %v2731_v20, %v2640_v19  ;;  %1304 = vmatpush.bf16.msra.mxu1 %v2637_v14 }
  0xf8   : > { %v2681_v27 = vor.u32 %v2742_v15, %v2680_v13 }
  0xf9   : > { %v707_v25 = vmul.f32 %v4002_v23, %v4002_v23  ;;  %1353 = vmatpush.bf16.msra.mxu2 %v2641_v21 }
  0xfa   : > { %1252 = vmatpush.bf16.msra.mxu0 %v2681_v27 }
  0xfb   : > { %734 = vadd.xlane.f32.xlu2 %v705_v24  ;;  %738 = vadd.xlane.f32.xlu1 %v707_v25  ;;  %v2729_v24 = vld [vmem:[#allocation8 + $0x8c] sm:$0xf]  ;;  %v2642_v25 = vld [vmem:[#allocation8 + $0x98] sm:$0xf0] }
  0xfc   : > { %v2645_v13 = vor.u32 %v2729_v24, %v2642_v25  ;;  %1305 = vmatpush.bf16.msra.mxu1 %v2621_v40  ;;  %v2716_v24 = vld [vmem:[#allocation8 + $0x24] sm:$0xf]  ;;  %v2714_v40 = vld [vmem:[#allocation8 + $0xc] sm:$0xf0] }
  0xfd   : > { %1354 = vmatpush.bf16.msra.mxu2 %v2625_v46 }
  0xfe   : > { %1253 = vmatpush.bf16.msra.mxu0 %v2665_v44  ;;  %1402 = vmatpush.bf16.msra.mxu3 %v2645_v13  ;;  %v2725_v44 = vld [vmem:[#allocation8 + $0x6c] sm:$0xf]  ;;  %v2586_v13 = vld [vmem:[#allocation8 + $0x30] sm:$0xf0] }
  0xff   : > { %v2629_v48 = vor.u32 %v2725_v44, %v2626_v47  ;;  %v2712_v47 = vld [vmem:[#allocation8 + $0x4] sm:$0xf] }
 0x100   : > { %1306 = vmatpush.bf16.msra.mxu1 %v2605_v1  ;;  %v2577_v1 = vor.u32 %v2715_v59, %v2576_v57 }
 0x101   : > { %1355 = vmatpush.bf16.msra.mxu2 %v2609_v2  ;;  %v2713_v2 = vld [vmem:[#allocation8 + $0xc] sm:$0xf] }
 0x102   : > { %1254 = vmatpush.bf16.msra.mxu0 %v2649_v60  ;;  %1403 = vmatpush.bf16.msra.mxu3 %v2629_v48  ;;  %v2570_v48 = vld [vmem:[#allocation8 + $0x10] sm:$0xf0] }
 0x103   : > { %v2573_v56 = vor.u32 %v2712_v47, %v2570_v48 }
 0x106   : > { %1255 = vmatpush.bf16.msra.mxu0 %v2633_v18  ;;  %v2584_v18 = vld [vmem:[#allocation8 + $0x20] sm:$0xf]  ;;  %1404 = vmatpush.bf16.msra.mxu3 %v2613_v8  ;;  %v2581_v8 = vor.u32 %v2713_v2, %v2578_v3 }
 0x107   : > { %v2585_v33 = vor.u32 %v2718_v10, %v2584_v18 }
 0x10a   : > { %1256 = vmatpush.bf16.msra.mxu0 %v2617_v35  ;;  %v2589_v35 = vor.u32 %v2716_v24, %v2586_v13 }
 0x10c   : > { %1307 = vmatpush.bf16.msra.mxu1 %v2589_v35 }
 0x10e   : > { %1257 = vmatpush.bf16.msra.mxu0 %v2601_v55  ;;  %v2569_v55 = vor.u32 %v2714_v40, %v2568_v37 }
 0x110   : > { %1308 = vmatpush.bf16.msra.mxu1 %v2573_v56  ;;  %v4119_v56 = vld [vmem:[%s5035_s21] ss:$0 sm:$0xff] }
 0x112   : > { %1258 = vmatpush.bf16.msra.mxu0 %v2585_v33 }
 0x116   : > { %1259 = vmatpush.bf16.msra.mxu0 %v2569_v55 }
 0x145   : > { %v713_v15 = vpop.xlane.xlu0 %712 }
 0x146   : > { %v709_v26 = vpop.xlane.xlu1 %708  ;;  %v742_v27 = vmul.f32 %v713_v15, %v3917_v22  ;;  %v2592_v15 = vld [vmem:[#allocation8 + $0x28] sm:$0xf] }
 0x147   : > { %v740_v30 = vmul.f32 %v709_v26, %v3917_v22 }
 0x148   : > { %v4022_v31 = vadd.f32 1e-05, %v742_v27  ;;  %v2719_v27 = vld [vmem:[#allocation8 + $0x34] sm:$0xf0] }
 0x149   : > { %v4024_v34 = vadd.f32 1e-05, %v740_v30  ;;  %v2717_v30 = vld [vmem:[#allocation8 + $0x2c] sm:$0xf]  ;;  %v2593_v44 = vor.u32 %v2719_v27, %v2592_v15 }
 0x14a   : > { %3147 = vrsqrt.f32 %v4022_v31  ;;  %vm798_vm1 = vweird.f32 %v4022_v31  ;;  %v2597_v46 = vor.u32 %v2717_v30, %v2594_v36 }
 0x14b   : > { %3149 = vrsqrt.f32 %v4024_v34  ;;  %1356 = vmatpush.bf16.msra.mxu2 %v2593_v44  ;;  %vm778_vm5 = vweird.f32 %v4024_v34 }
 0x14c   : > { %1405 = vmatpush.bf16.msra.mxu3 %v2597_v46 }
 0x14d   : > { %v719_v54 = vpop.xlane.xlu0 %718 }
 0x14e   : > { %v715_v60 = vpop.xlane.xlu1 %714  ;;  %v711_v61 = vpop.xlane.xlu2 %710  ;;  %v745_v62 = vmul.f32 %v719_v54, %v3917_v22 }
 0x14f   : > { %v743_v5 = vmul.f32 %v715_v60, %v3917_v22  ;;  %v741_v7 = vmul.f32 %v711_v61, %v3917_v22  ;;  %1357 = vmatpush.bf16.msra.mxu2 %v2577_v1 }
 0x150   : > { %v4031_v9 = vpop.eup %3147  ;;  %v4033_v11 = vadd.f32 1e-05, %v745_v62  ;;  %1406 = vmatpush.bf16.msra.mxu3 %v2581_v8 }
 0x151   : > { %v4035_v19 = vpop.eup %3149  ;;  %v793_v20 = vmul.f32 %v4031_v9, %v4022_v31  ;;  %v4039_v14 = vadd.f32 1e-05, %v743_v5  ;;  %v4041_v21 = vadd.f32 1e-05, %v741_v7  ;;  %vm799_vm2 = vweird.f32 %v4031_v9 }
 0x152   : > { %v773_v25 = vmul.f32 %v4035_v19, %v4024_v34  ;;  %3151 = vrsqrt.f32 %v4033_v11  ;;  %vm779_vm3 = vweird.f32 %v4035_v19  ;;  %vm4062_vm4 = vmor %vm798_vm1, %vm799_vm2  ;;  %vm828_vm7 = vweird.f32 %v4033_v11 }
 0x153   : > { %v794_v26 = vmul.f32 %v4031_v9, %v793_v20  ;;  %3153 = vrsqrt.f32 %v4039_v14  ;;  %vm780_vm6 = vmor %vm778_vm5, %vm779_vm3  ;;  %vm808_vm9 = vweird.f32 %v4039_v14  ;;  %vm788_vm10 = vweird.f32 %v4041_v21 }
 0x154   : > { %v774_v32 = vmul.f32 %v4035_v19, %v773_v25  ;;  %3155 = vrsqrt.f32 %v4041_v21 }
 0x155   : > { %v795_v42 = vmul.f32 0.5, %v794_v26  ;;  %v725_v43 = vpop.xlane.xlu0 %724 }
 0x156   : > { %v775_v49 = vmul.f32 0.5, %v774_v32  ;;  %v717_v50 = vpop.xlane.xlu2 %716  ;;  %v721_v53 = vpop.xlane.xlu1 %720  ;;  %v748_v54 = vmul.f32 %v725_v43, %v3917_v22 }
 0x157   : > { %v796_v60 = vsub.f32 1.5, %v795_v42  ;;  %v744_v61 = vmul.f32 %v717_v50, %v3917_v22  ;;  %v746_v62 = vmul.f32 %v721_v53, %v3917_v22 }
 0x158   : > { %v4055_v4 = vpop.eup %3151  ;;  %v776_v5 = vsub.f32 1.5, %v775_v49  ;;  %v4087_v32 = vadd.f32 1e-05, %v748_v54 }
 0x159   : > { %v4066_v18 = vpop.eup %3153  ;;  %v797_v10 = vmul.f32 %v4031_v9, %v796_v60  ;;  %v823_v20 = vmul.f32 %v4055_v4, %v4033_v11  ;;  %v4071_v24 = vadd.f32 1e-05, %v744_v61  ;;  %v4079_v15 = vadd.f32 1e-05, %v746_v62 }
 0x15a   : > { %v4073_v25 = vpop.eup %3155  ;;  %v777_v13 = vmul.f32 %v4035_v19, %v776_v5  ;;  %v803_v31 = vmul.f32 %v4066_v18, %v4039_v14  ;;  %vm829_vm8 = vweird.f32 %v4055_v4  ;;  %vm809_vm12 = vweird.f32 %v4066_v18 }
 0x15b   : > { %v801_v26 = vsel %vm4062_vm4, %v4031_v9, %v797_v10  ;;  %v783_v27 = vmul.f32 %v4073_v25, %v4041_v21  ;;  %v824_v30 = vmul.f32 %v4055_v4, %v823_v20  ;;  %3157 = vrsqrt.f32 %v4071_v24  ;;  %v4096_v9 = vld [vmem:[%s5034_s10] ss:$0 sm:$0xff]  ;;  %vm4127_vm13 = vmor %vm828_vm7, %vm829_vm8 }
 0x15c   : > { %v781_v34 = vsel %vm780_vm6, %v4035_v19, %v777_v13  ;;  %v804_v33 = vmul.f32 %v4066_v18, %v803_v31  ;;  %v934_v40 = vmul.f32 %v801_v26, %v3921_v28  ;;  %3159 = vrsqrt.f32 %v4079_v15  ;;  %vm4155_vm1 = vmor %vm808_vm9, %vm809_vm12 }
 0x15d   : > { %v784_v35 = vmul.f32 %v4073_v25, %v783_v27  ;;  %v825_v36 = vmul.f32 0.5, %v824_v30  ;;  %v932_v37 = vmul.f32 %v781_v34, %v3923_v29  ;;  %3161 = vrsqrt.f32 %v4087_v32  ;;  %v731_v49 = vpop.xlane.xlu0 %730 }
 0x15e   : > { %v805_v42 = vmul.f32 0.5, %v804_v33  ;;  %v723_v19 = vpop.xlane.xlu2 %722  ;;  %v727_v43 = vpop.xlane.xlu1 %726  ;;  %vm789_vm11 = vweird.f32 %v4073_v25  ;;  %v953_v54 = vmul.f32 %v4096_v9, %v934_v40  ;;  %vm818_vm14 = vweird.f32 %v4071_v24 }
 0x15f   : > { %v785_v44 = vmul.f32 0.5, %v784_v35  ;;  %v826_v46 = vsub.f32 1.5, %v825_v36  ;;  %v747_v48 = vmul.f32 %v723_v19, %v3917_v22  ;;  %v749_v29 = vmul.f32 %v727_v43, %v3917_v22  ;;  %vm4141_vm15 = vmor %vm788_vm10, %vm789_vm11 }
 0x160   : > { %v806_v47 = vsub.f32 1.5, %v805_v42  ;;  %v951_v53 = vmul.f32 %v4096_v9, %v932_v37  ;;  %vm838_vm0 = vweird.f32 %v4079_v15  ;;  %v751_v10 = vmul.f32 %v731_v49, %v3917_v22 }
 0x161   : > { %v786_v28 = vsub.f32 1.5, %v785_v44  ;;  %v4109_v50 = vpop.eup %3157  ;;  %v4114_v55 = vadd.f32 1e-05, %v747_v48  ;;  %v827_v59 = vmul.f32 %v4055_v4, %v826_v46  ;;  %v4147_v11 = vadd.f32 1e-05, %v749_v29 }
 0x162   : > { %v813_v61 = vmul.f32 %v4109_v50, %v4071_v24  ;;  %v4134_v62 = vpop.eup %3159  ;;  %v807_v1 = vmul.f32 %v4066_v18, %v806_v47  ;;  %vm858_vm2 = vweird.f32 %v4087_v32  ;;  %v4170_v13 = vadd.f32 %v4119_v56, %v951_v53 }
 0x163   : > { %v787_v57 = vmul.f32 %v4073_v25, %v786_v28  ;;  %3163 = vrsqrt.f32 %v4114_v55  ;;  %v4149_v3 = vpop.eup %3161  ;;  %v833_v8 = vmul.f32 %v4134_v62, %v4079_v15  ;;  %v4173_v31 = vadd.f32 %v4119_v56, %v953_v54 }
 0x164   : > { %v814_v7 = vmul.f32 %v4109_v50, %v813_v61  ;;  %v853_v20 = vmul.f32 %v4149_v3, %v4087_v32  ;;  %vm819_vm3 = vweird.f32 %v4109_v50  ;;  %v811_v34 = vsel %vm4155_vm1, %v4066_v18, %v807_v1 }
 0x165   : > { %v791_v21 = vsel %vm4141_vm15, %v4073_v25, %v787_v57  ;;  %v831_v25 = vsel %vm4127_vm13, %v4055_v4, %v827_v59  ;;  %v834_v27 = vmul.f32 %v4134_v62, %v833_v8  ;;  %3165 = vrsqrt.f32 %v4147_v11  ;;  %v737_v48 = vpop.xlane.xlu0 %736  ;;  %vm4202_vm5 = vmor %vm818_vm14, %vm819_vm3 }
 0x166   : > { %v729_v14 = vpop.xlane.xlu2 %728  ;;  %v815_v26 = vmul.f32 0.5, %v814_v7  ;;  %v733_v30 = vpop.xlane.xlu1 %732  ;;  %v933_v33 = vmul.f32 %v791_v21, %v3937_v41  ;;  %v854_v35 = vmul.f32 %v4149_v3, %v853_v20  ;;  %v4186_v40 = vadd.f32 1e-05, %v751_v10 }
 0x167   : > { %v835_v37 = vmul.f32 0.5, %v834_v27  ;;  %v750_v4 = vmul.f32 %v729_v14, %v3917_v22  ;;  %v937_v19 = vmul.f32 %v831_v25, %v3932_v38  ;;  %vm839_vm4 = vweird.f32 %v4134_v62 }
 0x168   : > { %v816_v36 = vsub.f32 1.5, %v815_v26  ;;  %v855_v43 = vmul.f32 0.5, %v854_v35  ;;  %v752_v18 = vmul.f32 %v733_v30, %v3917_v22  ;;  %v935_v41 = vmul.f32 %v811_v34, %v3934_v39  ;;  %vm4216_vm7 = vmor %vm838_vm0, %vm839_vm4 }
 0x169   : > { %v4189_v42 = vpop.eup %3163  ;;  %v836_v46 = vsub.f32 1.5, %v835_v37  ;;  %vm859_vm6 = vweird.f32 %v4149_v3  ;;  %3167 = vrsqrt.f32 %v4186_v40  ;;  %v4208_v39 = vadd.f32 1e-05, %v750_v4 }
 0x16a   : > { %v817_v44 = vmul.f32 %v4109_v50, %v816_v36  ;;  %v843_v47 = vmul.f32 %v4189_v42, %v4114_v55  ;;  %v856_v29 = vsub.f32 1.5, %v855_v43  ;;  %v952_v28 = vmul.f32 %v4096_v9, %v933_v33  ;;  %vm4247_vm9 = vmor %vm858_vm2, %vm859_vm6 }
 0x16b   : > { %v837_v49 = vmul.f32 %v4134_v62, %v836_v46  ;;  %v4221_v54 = vadd.f32 1e-05, %v752_v18  ;;  %v4223_v57 = vpop.eup %3165  ;;  %v4226_v59 = vmul.f32 %v4096_v9, %v937_v19  ;;  %vm848_vm8 = vweird.f32 %v4114_v55 }
 0x16c   : > { %v844_v53 = vmul.f32 %v4189_v42, %v843_v47  ;;  %3169 = vrsqrt.f32 %v4208_v39  ;;  %v754_v60 = vmul.f32 %v737_v48, %v3917_v22  ;;  %v821_v15 = vsel %vm4202_vm5, %v4109_v50, %v817_v44 }
 0x16d   : > { %v857_v61 = vmul.f32 %v4149_v3, %v856_v29  ;;  %v863_v2 = vmul.f32 %v4223_v57, %v4147_v11  ;;  %v4238_v21 = vmul.f32 %v4096_v9, %v935_v41  ;;  %v841_v7 = vsel %vm4216_vm7, %v4134_v62, %v837_v49 }
 0x16e   : > { %v845_v1 = vmul.f32 0.5, %v844_v53  ;;  %v735_v5 = vpop.xlane.xlu2 %734  ;;  %vm868_vm10 = vweird.f32 %v4147_v11  ;;  %3171 = vrsqrt.f32 %v4221_v54  ;;  %vm849_vm11 = vweird.f32 %v4189_v42  ;;  %v739_v20 = vpop.xlane.xlu1 %738 }
 0x16f   : > { %v864_v10 = vmul.f32 %v4223_v57, %v863_v2  ;;  %v4256_v62 = vadd.f32 %v4119_v56, %v952_v28  ;;  %v4258_v14 = vpop.eup %3167  ;;  %v936_v32 = vmul.f32 %v821_v15, %v3946_v45  ;;  %vm878_vm12 = vweird.f32 %v4208_v39  ;;  %vm4283_vm14 = vmor %vm848_vm8, %vm849_vm11 }
 0x170   : > { %v846_v8 = vsub.f32 1.5, %v845_v1  ;;  %v4262_v25 = vadd.f32 1e-05, %v754_v60  ;;  %v753_v26 = vmul.f32 %v735_v5, %v3917_v22  ;;  %v938_v27 = vmul.f32 %v841_v7, %v3952_v52 }
 0x171   : > { %v861_v30 = vsel %vm4247_vm9, %v4149_v3, %v857_v61  ;;  %v865_v34 = vmul.f32 0.5, %v864_v10  ;;  %v883_v33 = vmul.f32 %v4258_v14, %v4186_v40  ;;  %vm888_vm13 = vweird.f32 %v4186_v40 }
 0x172   : > { %v4272_v35 = vpop.eup %3169  ;;  %v847_v45 = vmul.f32 %v4189_v42, %v846_v8  ;;  %3173 = vrsqrt.f32 %v4262_v25  ;;  %v4276_v36 = vadd.f32 1e-05, %v753_v26  ;;  %v755_v52 = vmul.f32 %v739_v20, %v3917_v22 }
 0x173   : > { %v866_v37 = vsub.f32 1.5, %v865_v34  ;;  %vm869_vm15 = vweird.f32 %v4223_v57  ;;  %v884_v4 = vmul.f32 %v4258_v14, %v883_v33  ;;  %v873_v19 = vmul.f32 %v4272_v35, %v4208_v39 }
 0x174   : > { %v4291_v43 = vpop.eup %3171  ;;  %v4294_v22 = vmul.f32 %v4096_v9, %v936_v32  ;;  %v940_v18 = vmul.f32 %v861_v30, %v3950_v51  ;;  %vm898_vm0 = vweird.f32 %v4221_v54  ;;  %3175 = vrsqrt.f32 %v4276_v36  ;;  %vm4317_vm1 = vmor %vm868_vm10, %vm869_vm15 }
 0x175   : > { %v4300_v55 = vmul.f32 %v4096_v9, %v938_v27  ;;  %v885_v41 = vmul.f32 0.5, %v884_v4  ;;  %v874_v44 = vmul.f32 %v4272_v35, %v873_v19  ;;  %v893_v46 = vmul.f32 %v4291_v43, %v4221_v54  ;;  %v3142_v54 = vld [vmem:[%s598_s20] ss:$0 sm:$0xff]  ;;  %s5067_s20 = smov %s5066_s27 }
 0x176   : > { %v851_v47 = vsel %vm4283_vm14, %v4189_v42, %v847_v45  ;;  %v867_v48 = vmul.f32 %v4223_v57, %v866_v37  ;;  %v4309_v51 = vadd.f32 1e-05, %v755_v52  ;;  %v986_v38 = vpack.c.bf16 %v4170_v13, %v4170_v13  ;;  %1535 = vrot.lane.b32.xlu2 %v3142_v54, %s3593_s11  ;;  %s3383_s11 = scalar_lea.hbm %s5067_s20, 256 }
 0x177   : > { %v886_v28 = vsub.f32 1.5, %v885_v41  ;;  %v875_v49 = vmul.f32 0.5, %v874_v44  ;;  %vm879_vm2 = vweird.f32 %v4272_v35  ;;  %v894_v42 = vmul.f32 %v4291_v43, %v893_v46 }
 0x178   : > { %v4323_v24 = vpop.eup %3173  ;;  %v4326_v53 = vmul.f32 %v4096_v9, %v940_v18  ;;  %vm889_vm3 = vweird.f32 %v4258_v14  ;;  %3177 = vrsqrt.f32 %v4309_v51  ;;  %v987_v11 = vpack.c.bf16 %v4256_v62, %v4256_v62  ;;  %vm4345_vm4 = vmor %vm878_vm12, %vm879_vm2 }
 0x179   : > { %v939_v60 = vmul.f32 %v851_v47, %v3962_v58  ;;  %v876_v15 = vsub.f32 1.5, %v875_v49  ;;  %v895_v61 = vmul.f32 0.5, %v894_v42  ;;  %v913_v1 = vmul.f32 %v4323_v24, %v4262_v25  ;;  %vm4357_vm6 = vmor %vm888_vm13, %vm889_vm3 }
 0x17a   : > { %v4338_v2 = vpop.eup %3175  ;;  %v871_v5 = vsel %vm4317_vm1, %v4223_v57, %v867_v48  ;;  %vm899_vm5 = vweird.f32 %v4291_v43  ;;  %v1060_v58 = vunpack.c.l.b16 %v986_v38  ;;  %v1061_v50 = vunpack.c.l.b16 %v987_v11 }
 0x17b   : > { %v887_v8 = vmul.f32 %v4258_v14, %v886_v28  ;;  %v877_v10 = vmul.f32 %v4272_v35, %v876_v15  ;;  %v896_v20 = vsub.f32 1.5, %v895_v61  ;;  %v914_v32 = vmul.f32 %v4323_v24, %v913_v1  ;;  %vm4379_vm9 = vmor %vm898_vm0, %vm899_vm5 }
 0x17c   : > { %vm918_vm7 = vweird.f32 %v4262_v25  ;;  %vm919_vm8 = vweird.f32 %v4323_v24  ;;  %v903_v57 = vmul.f32 %v4338_v2, %v4276_v36  ;;  %v1076_v26 = vpack.c.b16 %v1061_v50, %v1060_v58 }
 0x17d   : > { %v881_v27 = vsel %vm4345_vm4, %v4272_v35, %v877_v10  ;;  %v897_v30 = vmul.f32 %v4291_v43, %v896_v20  ;;  %v915_v40 = vmul.f32 0.5, %v914_v32  ;;  %v2747_v34 = vpack.c.bf16 %v4256_v62, %v4170_v13  ;;  %vm4404_vm11 = vmor %vm918_vm7, %vm919_vm8 }
 0x17e   : > { %v4371_v33 = vpop.eup %3177  ;;  %v958_v45 = vmul.f32 %v4096_v9, %v939_v60  ;;  %v941_v52 = vmul.f32 %v871_v5, %v3970_v0  ;;  %v904_v35 = vmul.f32 %v4338_v2, %v903_v57  ;;  %1260 = vmatmul.bf16.vlgmr.msra.gmra.mxu0 %v1076_v26  ;;  %1309 = vmatmul.bf16.vlgmr.msra.gmra.mxu1 %v1076_v26  ;;  %vm908_vm10 = vweird.f32 %v4276_v36 }
 0x17f   : > { %v891_v13 = vsel %vm4357_vm6, %v4258_v14, %v887_v8  ;;  %v916_v62 = vsub.f32 1.5, %v915_v40  ;;  %v923_v0 = vmul.f32 %v4371_v33, %v4309_v51  ;;  %2748 = vst [vmem:[%s4391_s5] sm:$0xff] %v2747_v34   ;;  %1358 = vmatmul.bf16.vlgmr.msra.gmra.mxu2 %v1076_v26  ;;  %1407 = vmatmul.bf16.vlgmr.msra.gmra.mxu3 %v1076_v26  ;;  %vm909_vm12 = vweird.f32 %v4338_v2 }
 0x180   : > { %v942_v37 = vmul.f32 %v881_v27, %v3980_v6  ;;  %v905_v4 = vmul.f32 0.5, %v904_v35  ;;  %v973_v19 = vadd.f32 %v4119_v56, %v4238_v21  ;;  %v901_v18 = vsel %vm4379_vm9, %v4291_v43, %v897_v30  ;;  %vm4428_vm14 = vmor %vm908_vm10, %vm909_vm12 }
 0x181   : > { %v917_v6 = vmul.f32 %v4323_v24, %v916_v62  ;;  %v924_v41 = vmul.f32 %v4371_v33, %v923_v0  ;;  %v4418_v25 = vadd.f32 %v4119_v56, %v4294_v22  ;;  %v943_v44 = vmul.f32 %v891_v13, %v3967_v63 }
 0x182   : > { %v906_v46 = vsub.f32 1.5, %v905_v4  ;;  %vm928_vm13 = vweird.f32 %v4309_v51  ;;  %v2752_v21 = vpack.c.bf16 %v973_v19, %v4173_v31  ;;  %vm929_vm15 = vweird.f32 %v4371_v33 }
 0x183   : > { %v921_v43 = vsel %vm4404_vm11, %v4323_v24, %v917_v6  ;;  %v925_v22 = vmul.f32 0.5, %v924_v41  ;;  %v4435_v63 = vadd.f32 %v4119_v56, %v4226_v59  ;;  %v960_v48 = vmul.f32 %v4096_v9, %v941_v52  ;;  %vm4452_vm0 = vmor %vm928_vm13, %vm929_vm15 }
 0x184   : > { %v944_v38 = vmul.f32 %v901_v18, %v3988_v17  ;;  %v907_v29 = vmul.f32 %v4338_v2, %v906_v46  ;;  %v989_v28 = vpack.c.bf16 %v973_v19, %v973_v19  ;;  %2904 = vst [vmem:[%s4391_s5 + $0x8] sm:$0xff] %v2752_v21   ;;  %v961_v36 = vmul.f32 %v4096_v9, %v942_v37 }
 0x185   : > { %v926_v49 = vsub.f32 1.5, %v925_v22  ;;  %v988_v42 = vpack.c.bf16 %v4173_v31, %v4173_v31  ;;  %v2757_v24 = vpack.c.bf16 %v4435_v63, %v4418_v25  ;;  %v946_v59 = vmul.f32 %v921_v43, %v3985_v16 }
 0x186   : > { %v911_v11 = vsel %vm4428_vm14, %v4338_v2, %v907_v29  ;;  %v962_v60 = vmul.f32 %v4096_v9, %v943_v44  ;;  %v977_v61 = vadd.f32 %v4119_v56, %v958_v45  ;;  %v963_v16 = vmul.f32 %v4096_v9, %v944_v38 }
 0x187   : > { %v945_v15 = vmul.f32 %v911_v11, %v3998_v12  ;;  %v927_v31 = vmul.f32 %v4371_v33, %v926_v49  ;;  %2905 = vst [vmem:[%s4391_s5 + $0x10] sm:$0xff] %v2757_v24   ;;  %v1063_v1 = vunpack.c.l.b16 %v989_v28  ;;  %v976_v51 = vadd.f32 %v4119_v56, %v4300_v55 }
 0x188   : > { %v979_v2 = vadd.f32 %v4119_v56, %v960_v48  ;;  %v1062_v12 = vunpack.c.l.b16 %v988_v42  ;;  %v978_v7 = vadd.f32 %v4119_v56, %v4326_v53  ;;  %v4471_v58 = vadd.f32 %v4119_v56, %v961_v36  ;;  %v4497_v36 = vld [vmem:[%s5064_s8] sm:$0xf] }
 0x189   : > { %v931_v5 = vsel %vm4452_vm0, %v4371_v33, %v927_v31  ;;  %v965_v50 = vmul.f32 %v4096_v9, %v946_v59  ;;  %v964_v8 = vmul.f32 %v4096_v9, %v945_v15  ;;  %v2762_v10 = vpack.c.bf16 %v977_v61, %v976_v51  ;;  %v4507_v42 = vld [vmem:[%s595_s13] ss:$0 sm:$0xff]  ;;  %s5065_s13 = sld [smem:[#allocation23_spill]] }
 0x18a   : > { %v947_v55 = vmul.f32 %v931_v5, %v4002_v23  ;;  %v2767_v20 = vpack.c.bf16 %v979_v2, %v978_v7  ;;  %v981_v32 = vadd.f32 %v4119_v56, %v962_v60  ;;  %v1077_v57 = vpack.c.b16 %v1063_v1, %v1062_v12 }
 0x18b   : > { %2906 = vst [vmem:[%s4391_s5 + $0x18] sm:$0xff] %v2762_v10   ;;  %v982_v53 = vadd.f32 %v4119_v56, %v963_v16  ;;  %v983_v27 = vadd.f32 %v4119_v56, %v964_v8  ;;  %v984_v30 = vadd.f32 %v4119_v56, %v965_v50  ;;  %v990_v0 = vpack.c.bf16 %v4418_v25, %v4418_v25 }
 0x18c   : > { %v966_v39 = vmul.f32 %v4096_v9, %v947_v55  ;;  %2907 = vst [vmem:[%s4391_s5 + $0x20] sm:$0xff] %v2767_v20   ;;  %v2772_v26 = vpack.c.bf16 %v981_v32, %v4471_v58  ;;  %v991_v14 = vpack.c.bf16 %v4435_v63, %v4435_v63  ;;  %v993_v18 = vpack.c.bf16 %v977_v61, %v977_v61 }
 0x18d   : > { %v998_v23 = vpack.c.bf16 %v982_v53, %v982_v53  ;;  %v999_v40 = vpack.c.bf16 %v983_v27, %v983_v27  ;;  %v2777_v34 = vpack.c.bf16 %v983_v27, %v982_v53  ;;  %v1000_v33 = vpack.c.bf16 %v984_v30, %v984_v30 }
 0x18e   : > { %1265 = vmatmul.bf16.gmra.mxu0 %v1077_v57  ;;  %1314 = vmatmul.bf16.gmra.mxu1 %v1077_v57  ;;  %2908 = vst [vmem:[%s4391_s5 + $0x28] sm:$0xff] %v2772_v26   ;;  %v985_v9 = vadd.f32 %v4119_v56, %v966_v39  ;;  %v1064_v56 = vunpack.c.l.b16 %v990_v0  ;;  %v1065_v4 = vunpack.c.l.b16 %v991_v14  ;;  %v992_v6 = vpack.c.bf16 %v976_v51, %v976_v51 }
 0x18f   : > { %1363 = vmatmul.bf16.gmra.mxu2 %v1077_v57  ;;  %1412 = vmatmul.bf16.gmra.mxu3 %v1077_v57  ;;  %v1072_v3 = vunpack.c.l.b16 %v998_v23  ;;  %v1073_v35 = vunpack.c.l.b16 %v999_v40  ;;  %2909 = vst [vmem:[%s4391_s5 + $0x30] sm:$0xff] %v2777_v34   ;;  %v1074_v13 = vunpack.c.l.b16 %v1000_v33  ;;  %v1067_v41 = vunpack.c.l.b16 %v993_v18  ;;  %s2698_s17 = sshll.u32 %s5065_s13, 4  ;;  %s2203_s13 = scalar_lea.sflag [#allocation4], %s3848_s28 }
 0x190   : > { %v1001_v45 = vpack.c.bf16 %v985_v9, %v985_v9  ;;  %v2782_v52 = vpack.c.bf16 %v985_v9, %v984_v30  ;;  %v1078_v19 = vpack.c.b16 %v1065_v4, %v1064_v56  ;;  %v1066_v44 = vunpack.c.l.b16 %v992_v6  ;;  %s2229_s21 = sadd.s32 %s2699_s1, %s2698_s17 }
 0x191   : > { %v1082_v54 = vpack.c.b16 %v1073_v35, %v1072_v3  ;;  %v995_v25 = vpack.c.bf16 %v979_v2, %v979_v2  ;;  %v994_v21 = vpack.c.bf16 %v978_v7, %v978_v7  ;;  %v996_v63 = vpack.c.bf16 %v4471_v58, %v4471_v58 }
 0x192   : > { %v1075_v62 = vunpack.c.l.b16 %v1001_v45  ;;  %2910 = vst [vmem:[%s4391_s5 + $0x38] sm:$0xff] %v2782_v52   ;;  %v1079_v46 = vpack.c.b16 %v1067_v41, %v1066_v44  ;;  %v997_v48 = vpack.c.bf16 %v981_v32, %v981_v32  ;;  %v4500_v49 = vperm.slane %v4497_v36, 3 }
 0x193   : > { %v1069_v43 = vunpack.c.l.b16 %v995_v25  ;;  %v1068_v47 = vunpack.c.l.b16 %v994_v21  ;;  %v1070_v38 = vunpack.c.l.b16 %v996_v63  ;;  %v3594_v60 = vmov 0  }
 0x194   : > { %v1083_v37 = vpack.c.b16 %v1075_v62, %v1074_v13  ;;  %v1071_v29 = vunpack.c.l.b16 %v997_v48  ;;  %3080 = vset.pattern.permute.xlu0 %v3594_v60  ;;  %3086 = vset.pattern.permute.xlu1 %v3594_v60  ;;  %v3595_v15 = vmov 1   ;;  %v4518_v16 = vperm.slane %v4497_v36, 2 }
 0x195   : > { %v1080_v22 = vpack.c.b16 %v1069_v43, %v1068_v47  ;;  %3083 = vset.pattern.permute.xlu2 %v3595_v15 }
 0x196   : > { %v1081_v28 = vpack.c.b16 %v1071_v29, %v1070_v38 }
 0x19e   : > { %1270 = vmatmul.bf16.gmra.mxu0 %v1078_v19  ;;  %1319 = vmatmul.bf16.gmra.mxu1 %v1078_v19 }
 0x19f   : > { %1368 = vmatmul.bf16.gmra.mxu2 %v1078_v19  ;;  %1417 = vmatmul.bf16.gmra.mxu3 %v1078_v19 }
 0x1ae   : > { %1275 = vmatmul.bf16.gmra.mxu0 %v1079_v46  ;;  %1324 = vmatmul.bf16.gmra.mxu1 %v1079_v46 }
 0x1af   : > { %1373 = vmatmul.bf16.gmra.mxu2 %v1079_v46  ;;  %1422 = vmatmul.bf16.gmra.mxu3 %v1079_v46 }
 0x1be   : > { %1280 = vmatmul.bf16.gmra.mxu0 %v1080_v22  ;;  %1329 = vmatmul.bf16.gmra.mxu1 %v1080_v22 }
 0x1bf   : > { %1378 = vmatmul.bf16.gmra.mxu2 %v1080_v22  ;;  %1427 = vmatmul.bf16.gmra.mxu3 %v1080_v22 }
 0x1ce   : > { %1285 = vmatmul.bf16.gmra.mxu0 %v1081_v28  ;;  %1334 = vmatmul.bf16.gmra.mxu1 %v1081_v28 }
 0x1cf   : > { %1383 = vmatmul.bf16.gmra.mxu2 %v1081_v28  ;;  %1432 = vmatmul.bf16.gmra.mxu3 %v1081_v28 }
 0x1d0   : > { %v4509_v24 = vpop.permute.xlu2 %1535 }
 0x1de   : > { %1290 = vmatmul.bf16.gmra.mxu0 %v1082_v54  ;;  %1339 = vmatmul.bf16.gmra.mxu1 %v1082_v54 }
 0x1df   : > { %1388 = vmatmul.bf16.gmra.mxu2 %v1082_v54  ;;  %1437 = vmatmul.bf16.gmra.mxu3 %v1082_v54 }
 0x1ee   : > { %1295 = vmatmul.bf16.gmra.mxu0 %v1083_v37  ;;  %1344 = vmatmul.bf16.gmra.mxu1 %v1083_v37 }
 0x1ef   : > { %1393 = vmatmul.bf16.gmra.mxu2 %v1083_v37  ;;  %1442 = vmatmul.bf16.gmra.mxu3 %v1083_v37 }
 0x202   : > { %v1359_v59 = vpop.f32.mrf.mxu2  ;;  %v1408_v11 = vpop.f32.mrf.mxu3 }
 0x203   : > { %v1409_v17 = vadd.f32 %v1408_v11, %v4500_v49  ;;  %v1360_v12 = vadd.f32 %v1359_v59, %v4518_v16 }
 0x205   : > { %v1452_v31 = vadd.f32 %v4507_v42, %v1409_v17  ;;  %v1538_v61 = vadd.f32 %v4509_v24, %v1409_v17 }
 0x207   : > { %v1468_v1 = vmul.f32 0.5, %v1452_v31  ;;  %v1554_v51 = vmul.f32 0.5, %v1538_v61 }
 0x209   : > { %3179 = vtanh.f32 %v1468_v1 }
 0x20a   : > { %v1361_v2 = vpop.f32.mrf.mxu2  ;;  %v1410_v5 = vpop.f32.mrf.mxu3  ;;  %3181 = vtanh.f32 %v1554_v51 }
 0x20b   : > { %v1362_v7 = vadd.f32 %v1361_v2, %v4518_v16  ;;  %v1411_v58 = vadd.f32 %v1410_v5, %v4500_v49 }
 0x20d   : > { %v2867_v50 = vpack.c.bf16 %v1362_v7, %v1360_v12  ;;  %v1453_v8 = vadd.f32 %v4507_v42, %v1411_v58  ;;  %v1539_v55 = vadd.f32 %v4509_v24, %v1411_v58 }
 0x20f   : > { %v3180_v10 = vpop.eup %3179  ;;  %2868 = vst [vmem:[%s4526_s9] sm:$0xff] %v2867_v50   ;;  %v1469_v20 = vmul.f32 0.5, %v1453_v8  ;;  %v1555_v39 = vmul.f32 0.5, %v1539_v55 }
 0x210   : > { %v3182_v32 = vpop.eup %3181  ;;  %v1500_v57 = vadd.f32 1.0, %v3180_v10 }
 0x211   : > { %3183 = vtanh.f32 %v1469_v20  ;;  %v1586_v53 = vadd.f32 1.0, %v3182_v32 }
 0x212   : > { %v1364_v26 = vpop.f32.mrf.mxu2  ;;  %v1413_v27 = vpop.f32.mrf.mxu3  ;;  %v1516_v23 = vmul.f32 0.5, %v1500_v57  ;;  %3185 = vtanh.f32 %v1555_v39 }
 0x213   : > { %v1414_v30 = vadd.f32 %v1413_v27, %v4500_v49  ;;  %v1602_v9 = vmul.f32 0.5, %v1586_v53  ;;  %v1365_v54 = vadd.f32 %v1364_v26, %v4518_v16 }
 0x214   : > { %1734 = vperm.xlu0 %3080, %v1516_v23   ;;  %v1620_v47 = vsub.f32 1.0, %v1516_v23 }
 0x215   : > { %v1540_v40 = vadd.f32 %v4509_v24, %v1414_v30  ;;  %v1863_v34 = vsub.f32 1.0, %v1602_v9  ;;  %v1454_v45 = vadd.f32 %v4507_v42, %v1414_v30 }
 0x217   : > { %v3184_v33 = vpop.eup %3183  ;;  %1881 = vperm.xlu2 %3083, %v1863_v34   ;;  %v1556_v3 = vmul.f32 0.5, %v1540_v40  ;;  %v1470_v37 = vmul.f32 0.5, %v1454_v45 }
 0x218   : > { %v1501_v52 = vadd.f32 1.0, %v3184_v33  ;;  %v3186_v35 = vpop.eup %3185 }
 0x219   : > { %3187 = vtanh.f32 %v1556_v3  ;;  %v1587_v19 = vadd.f32 1.0, %v3186_v35 }
 0x21a   : > { %v1517_v13 = vmul.f32 0.5, %v1501_v52  ;;  %v1366_v62 = vpop.f32.mrf.mxu2  ;;  %v1415_v0 = vpop.f32.mrf.mxu3  ;;  %3189 = vtanh.f32 %v1470_v37 }
 0x21b   : > { %v1367_v14 = vadd.f32 %v1366_v62, %v4518_v16  ;;  %v1416_v56 = vadd.f32 %v1415_v0, %v4500_v49  ;;  %v1603_v41 = vmul.f32 0.5, %v1587_v19 }
 0x21c   : > { %3081 = vset.pattern.permute.xlu0 %v3595_v15  ;;  %v1621_v4 = vsub.f32 1.0, %v1517_v13 }
 0x21d   : > { %v2872_v18 = vpack.c.bf16 %v1367_v14, %v1365_v54  ;;  %1977 = vperm.xlu0 %3081, %v1602_v9   ;;  %v1455_v6 = vadd.f32 %v4507_v42, %v1416_v56  ;;  %v1864_v48 = vsub.f32 1.0, %v1603_v41  ;;  %v1541_v29 = vadd.f32 %v4509_v24, %v1416_v56 }
 0x21e   : > { %1643 = vperm.xlu1 %3086, %v1621_v4  }
 0x21f   : > { %2925 = vst [vmem:[%s4526_s9 + $0x8] sm:$0xff] %v2872_v18   ;;  %3084 = vset.pattern.permute.xlu2 %v3594_v60  ;;  %v3188_v44 = vpop.eup %3187  ;;  %v1471_v21 = vmul.f32 0.5, %v1455_v6  ;;  %v1557_v51 = vmul.f32 0.5, %v1541_v29 }
 0x220   : > { %1739 = vperm.xlu2 %3084, %v1517_v13   ;;  %v3190_v22 = vpop.eup %3189  ;;  %v1588_v63 = vadd.f32 1.0, %v3188_v44 }
 0x221   : > { %3191 = vtanh.f32 %v1471_v21  ;;  %v1502_v28 = vadd.f32 1.0, %v3190_v22 }
 0x222   : > { %v1369_v46 = vpop.f32.mrf.mxu2  ;;  %v1418_v25 = vpop.f32.mrf.mxu3  ;;  %v1604_v59 = vmul.f32 0.5, %v1588_v63 }
 0x223   : > { %v1419_v43 = vadd.f32 %v1418_v25, %v4500_v49  ;;  %v1370_v31 = vadd.f32 %v1369_v46, %v4518_v16  ;;  %v1518_v2 = vmul.f32 0.5, %v1502_v28 }
 0x224   : > { %v1865_v7 = vsub.f32 1.0, %v1604_v59 }
 0x225   : > { %3082 = vset.pattern.permute.xlu0 %v3594_v60  ;;  %v1456_v38 = vadd.f32 %v4507_v42, %v1419_v43  ;;  %v1542_v58 = vadd.f32 %v4509_v24, %v1419_v43  ;;  %v1622_v50 = vsub.f32 1.0, %v1518_v2 }
 0x226   : > { %1638 = vperm.xlu0 %3082, %v1620_v47   ;;  %3087 = vset.pattern.permute.xlu1 %v3595_v15 }
 0x227   : > { %1886 = vperm.xlu1 %3087, %v1864_v48   ;;  %v1472_v61 = vmul.f32 0.5, %v1456_v38  ;;  %v3192_v5 = vpop.eup %3191  ;;  %v1558_v32 = vmul.f32 0.5, %v1542_v58 }
 0x228   : > { %3085 = vset.pattern.permute.xlu2 %v3595_v15  ;;  %v1503_v8 = vadd.f32 1.0, %v3192_v5 }
 0x229   : > { %1982 = vperm.xlu2 %3085, %v1603_v41   ;;  %3193 = vtanh.f32 %v1472_v61 }
 0x22a   : > { %v1371_v11 = vpop.f32.mrf.mxu2  ;;  %v1420_v17 = vpop.f32.mrf.mxu3  ;;  %3195 = vtanh.f32 %v1557_v51  ;;  %v1519_v39 = vmul.f32 0.5, %v1503_v8 }
 0x22b   : > { %v1372_v1 = vadd.f32 %v1371_v11, %v4518_v16  ;;  %3197 = vtanh.f32 %v1558_v32  ;;  %v1421_v9 = vadd.f32 %v1420_v17, %v4500_v49 }
 0x22c   : > { %v1623_v30 = vsub.f32 1.0, %v1519_v39 }
 0x22d   : > { %v2877_v12 = vpack.c.bf16 %v1372_v1, %v1370_v31  ;;  %v1457_v13 = vadd.f32 %v4507_v42, %v1421_v9  ;;  %v1543_v21 = vadd.f32 %v4509_v24, %v1421_v9 }
 0x22e   : > { %3091 = vset.pattern.permute.xlu0 %v3595_v15 }
 0x22f   : > { %2926 = vst [vmem:[%s4526_s9 + $0x10] sm:$0xff] %v2877_v12   ;;  %3088 = vset.pattern.permute.xlu1 %v3594_v60  ;;  %1891 = vperm.xlu0 %3091, %v1865_v7   ;;  %v3194_v57 = vpop.eup %3193  ;;  %v1473_v18 = vmul.f32 0.5, %v1457_v13  ;;  %v1559_v63 = vmul.f32 0.5, %v1543_v21 }
 0x230   : > { %1744 = vperm.xlu1 %3088, %v1518_v2   ;;  %v3196_v26 = vpop.eup %3195  ;;  %v1504_v23 = vadd.f32 1.0, %v3194_v57 }
 0x231   : > { %3090 = vset.pattern.permute.xlu2 %v3594_v60  ;;  %v1589_v40 = vadd.f32 1.0, %v3196_v26  ;;  %v3198_v37 = vpop.eup %3197 }
 0x232   : > { %1648 = vperm.xlu2 %3090, %v1622_v50   ;;  %v1374_v55 = vpop.f32.mrf.mxu2  ;;  %v1423_v10 = vpop.f32.mrf.mxu3  ;;  %v1520_v3 = vmul.f32 0.5, %v1504_v23  ;;  %v1590_v19 = vadd.f32 1.0, %v3198_v37 }
 0x233   : > { %v1424_v20 = vadd.f32 %v1423_v10, %v4500_v49  ;;  %v1375_v45 = vadd.f32 %v1374_v55, %v4518_v16  ;;  %v1605_v54 = vmul.f32 0.5, %v1589_v40 }
 0x234   : > { %v1624_v56 = vsub.f32 1.0, %v1520_v3  ;;  %v1606_v25 = vmul.f32 0.5, %v1590_v19 }
 0x235   : > { %v1458_v53 = vadd.f32 %v4507_v42, %v1424_v20  ;;  %v1544_v35 = vadd.f32 %v4509_v24, %v1424_v20  ;;  %v1866_v41 = vsub.f32 1.0, %v1605_v54 }
 0x236   : > { %v1867_v48 = vsub.f32 1.0, %v1606_v25 }
 0x237   : > { %v1474_v27 = vmul.f32 0.5, %v1458_v53  ;;  %3092 = vset.pattern.permute.xlu0 %v3594_v60  ;;  %v1560_v14 = vmul.f32 0.5, %v1544_v35 }
 0x238   : > { %1749 = vperm.xlu0 %3092, %v1519_v39   ;;  %3089 = vset.pattern.permute.xlu1 %v3595_v15 }
 0x239   : > { %1987 = vperm.xlu1 %3089, %v1604_v59   ;;  %3199 = vtanh.f32 %v1474_v27 }
 0x23a   : > { %1653 = vperm.xlu2 %3090, %v1623_v30   ;;  %v1376_v34 = vpop.f32.mrf.mxu2  ;;  %v1425_v33 = vpop.f32.mrf.mxu3  ;;  %3201 = vtanh.f32 %v1560_v14 }
 0x23b   : > { %v1377_v52 = vadd.f32 %v1376_v34, %v4518_v16  ;;  %v1426_v0 = vadd.f32 %v1425_v33, %v4500_v49  ;;  %3203 = vtanh.f32 %v1473_v18 }
 0x23d   : > { %v2882_v62 = vpack.c.bf16 %v1377_v52, %v1375_v45  ;;  %v1459_v6 = vadd.f32 %v4507_v42, %v1426_v0  ;;  %v1545_v29 = vadd.f32 %v4509_v24, %v1426_v0 }
 0x23f   : > { %2927 = vst [vmem:[%s4526_s9 + $0x18] sm:$0xff] %v2882_v62   ;;  %v3200_v4 = vpop.eup %3199  ;;  %v1475_v43 = vmul.f32 0.5, %v1459_v6  ;;  %v1561_v1 = vmul.f32 0.5, %v1545_v29 }
 0x240   : > { %3093 = vset.pattern.permute.xlu0 %v3595_v15  ;;  %v1506_v46 = vadd.f32 1.0, %v3200_v4  ;;  %v3202_v38 = vpop.eup %3201 }
 0x241   : > { %1992 = vperm.xlu0 %3093, %v1605_v54   ;;  %3097 = vset.pattern.permute.xlu1 %v3594_v60  ;;  %3205 = vtanh.f32 %v1475_v43  ;;  %v3204_v59 = vpop.eup %3203  ;;  %v1592_v61 = vadd.f32 1.0, %v3202_v38 }
 0x242   : > { %3094 = vset.pattern.permute.xlu2 %v3595_v15  ;;  %1658 = vperm.xlu1 %3097, %v1624_v56   ;;  %v1379_v44 = vpop.f32.mrf.mxu2  ;;  %v1428_v47 = vpop.f32.mrf.mxu3  ;;  %v4568_v22 = vmul.f32 0.5, %v1506_v46  ;;  %3207 = vtanh.f32 %v1559_v63  ;;  %v1505_v51 = vadd.f32 1.0, %v3204_v59 }
 0x243   : > { %1896 = vperm.xlu2 %3094, %v1866_v41   ;;  %v1380_v11 = vadd.f32 %v1379_v44, %v4518_v16  ;;  %v4578_v12 = vmul.f32 0.5, %v1592_v61  ;;  %3209 = vtanh.f32 %v1561_v1  ;;  %v1429_v34 = vadd.f32 %v1428_v47, %v4500_v49 }
 0x244   : > { %v1521_v50 = vmul.f32 0.5, %v1505_v51  ;;  %v1626_v37 = vsub.f32 1.0, %v4568_v22 }
 0x245   : > { %v1460_v35 = vadd.f32 %v4507_v42, %v1429_v34  ;;  %v1546_v41 = vadd.f32 %v4509_v24, %v1429_v34 }
 0x246   : > { %v1625_v40 = vsub.f32 1.0, %v1521_v50 }
 0x247   : > { %v3206_v2 = vpop.eup %3205  ;;  %v1476_v56 = vmul.f32 0.5, %v1460_v35 }
 0x248   : > { %v1507_v7 = vadd.f32 1.0, %v3206_v2  ;;  %v3208_v8 = vpop.eup %3207 }
 0x249   : > { %3103 = vset.pattern.permute.xlu0 %v3594_v60  ;;  %v1591_v20 = vadd.f32 1.0, %v3208_v8  ;;  %v3210_v39 = vpop.eup %3209 }
 0x24a   : > { %1764 = vperm.xlu0 %3103, %v4568_v22   ;;  %3098 = vset.pattern.permute.xlu1 %v3595_v15  ;;  %v1381_v28 = vpop.f32.mrf.mxu2  ;;  %v1430_v5 = vpop.f32.mrf.mxu3  ;;  %v4585_v10 = vmul.f32 0.5, %v1507_v7  ;;  %v1593_v27 = vadd.f32 1.0, %v3210_v39  ;;  %v1869_v22 = vsub.f32 1.0, %v4578_v12 }
 0x24b   : > { %3095 = vset.pattern.permute.xlu2 %v3594_v60  ;;  %v1382_v17 = vadd.f32 %v1381_v28, %v4518_v16  ;;  %1901 = vperm.xlu1 %3098, %v1867_v48   ;;  %v1431_v55 = vadd.f32 %v1430_v5, %v4500_v49  ;;  %v1607_v26 = vmul.f32 0.5, %v1591_v20  ;;  %v1562_v48 = vmul.f32 0.5, %v1546_v41 }
 0x24c   : > { %1754 = vperm.xlu2 %3095, %v1520_v3   ;;  %v1627_v53 = vsub.f32 1.0, %v4585_v10  ;;  %v1609_v52 = vmul.f32 0.5, %v1593_v27 }
 0x24d   : > { %v2887_v31 = vpack.c.bf16 %v1382_v17, %v1380_v11  ;;  %v1461_v32 = vadd.f32 %v4507_v42, %v1431_v55  ;;  %v1547_v3 = vadd.f32 %v4509_v24, %v1431_v55  ;;  %v1868_v19 = vsub.f32 1.0, %v1607_v26 }
 0x24e   : > { %v1870_v0 = vsub.f32 1.0, %v1609_v52 }
 0x24f   : > { %2928 = vst [vmem:[%s4526_s9 + $0x20] sm:$0xff] %v2887_v31   ;;  %v1477_v23 = vmul.f32 0.5, %v1461_v32  ;;  %v1563_v54 = vmul.f32 0.5, %v1547_v3  ;;  %v1261_v3 = vpop.f32.mrf.mxu0 }
 0x251   : > { %3211 = vtanh.f32 %v1477_v23 }
 0x252   : > { %3104 = vset.pattern.permute.xlu0 %v3595_v15  ;;  %v1384_v58 = vpop.f32.mrf.mxu2  ;;  %v1433_v45 = vpop.f32.mrf.mxu3  ;;  %3213 = vtanh.f32 %v1563_v54 }
 0x253   : > { %2007 = vperm.xlu0 %3104, %v4578_v12   ;;  %3099 = vset.pattern.permute.xlu1 %v3594_v60  ;;  %v1385_v30 = vadd.f32 %v1384_v58, %v4518_v16  ;;  %v1434_v13 = vadd.f32 %v1433_v45, %v4500_v49  ;;  %3215 = vtanh.f32 %v1476_v56 }
 0x254   : > { %3096 = vset.pattern.permute.xlu2 %v3595_v15  ;;  %1759 = vperm.xlu1 %3099, %v1521_v50  }
 0x255   : > { %1997 = vperm.xlu2 %3096, %v1606_v25   ;;  %v1462_v4 = vadd.f32 %v4507_v42, %v1434_v13  ;;  %v1548_v38 = vadd.f32 %v4509_v24, %v1434_v13 }
 0x257   : > { %v3212_v14 = vpop.eup %3211  ;;  %v1478_v6 = vmul.f32 0.5, %v1462_v4  ;;  %v1564_v11 = vmul.f32 0.5, %v1548_v38  ;;  %v1310_v4 = vpop.f32.mrf.mxu1 }
 0x258   : > { %v1509_v18 = vadd.f32 1.0, %v3212_v14  ;;  %v3214_v63 = vpop.eup %3213 }
 0x259   : > { %3217 = vtanh.f32 %v1478_v6  ;;  %v3216_v29 = vpop.eup %3215  ;;  %v1595_v59 = vadd.f32 1.0, %v3214_v63  ;;  %v4661_v63 = vperm.slane %v4497_v36, 0 }
 0x25a   : > { %v1386_v57 = vpop.f32.mrf.mxu2  ;;  %v1435_v44 = vpop.f32.mrf.mxu3  ;;  %v4607_v43 = vmul.f32 0.5, %v1509_v18  ;;  %3219 = vtanh.f32 %v1562_v48  ;;  %v1508_v31 = vadd.f32 1.0, %v3216_v29 }
 0x25b   : > { %v1387_v9 = vadd.f32 %v1386_v57, %v4518_v16  ;;  %3109 = vset.pattern.permute.xlu0 %v3594_v60  ;;  %v4619_v51 = vmul.f32 0.5, %v1595_v59  ;;  %3221 = vtanh.f32 %v1564_v11  ;;  %v1436_v27 = vadd.f32 %v1435_v44, %v4500_v49 }
 0x25c   : > { %1673 = vperm.xlu0 %3109, %v1627_v53   ;;  %3100 = vset.pattern.permute.xlu1 %v3595_v15  ;;  %v1524_v5 = vmul.f32 0.5, %v1508_v31  ;;  %v1629_v54 = vsub.f32 1.0, %v4607_v43  ;;  %v4668_v59 = vperm.slane %v4497_v36, 1 }
 0x25d   : > { %v2892_v33 = vpack.c.bf16 %v1387_v9, %v1385_v30  ;;  %3101 = vset.pattern.permute.xlu2 %v3594_v60  ;;  %2002 = vperm.xlu1 %3100, %v1607_v26   ;;  %v1463_v34 = vadd.f32 %v4507_v42, %v1436_v27  ;;  %v1549_v41 = vadd.f32 %v4509_v24, %v1436_v27  ;;  %v1872_v48 = vsub.f32 1.0, %v4619_v51 }
 0x25e   : > { %1663 = vperm.xlu2 %3101, %v1625_v40   ;;  %v1628_v9 = vsub.f32 1.0, %v1524_v5 }
 0x25f   : > { %2929 = vst [vmem:[%s4526_s9 + $0x28] sm:$0xff] %v2892_v33   ;;  %v3218_v61 = vpop.eup %3217  ;;  %v1479_v13 = vmul.f32 0.5, %v1463_v34  ;;  %v1565_v29 = vmul.f32 0.5, %v1549_v41 }
 0x260   : > { %v1510_v2 = vadd.f32 1.0, %v3218_v61  ;;  %v3220_v7 = vpop.eup %3219 }
 0x261   : > { %v1594_v32 = vadd.f32 1.0, %v3220_v7  ;;  %v3222_v39 = vpop.eup %3221  ;;  %v1262_v7 = vadd.f32 %v1261_v3, %v4661_v63 }
 0x262   : > { %v1389_v62 = vpop.f32.mrf.mxu2  ;;  %v1438_v1 = vpop.f32.mrf.mxu3  ;;  %v4626_v58 = vmul.f32 0.5, %v1510_v2  ;;  %v1596_v26 = vadd.f32 1.0, %v3222_v39 }
 0x263   : > { %v1390_v25 = vadd.f32 %v1389_v62, %v4518_v16  ;;  %v1439_v12 = vadd.f32 %v1438_v1, %v4500_v49  ;;  %v1610_v30 = vmul.f32 0.5, %v1594_v32 }
 0x264   : > { %3110 = vset.pattern.permute.xlu0 %v3595_v15  ;;  %v1630_v53 = vsub.f32 1.0, %v4626_v58  ;;  %v4639_v40 = vmul.f32 0.5, %v1596_v26 }
 0x265   : > { %1916 = vperm.xlu0 %3110, %v1870_v0   ;;  %3105 = vset.pattern.permute.xlu1 %v3594_v60  ;;  %v1464_v55 = vadd.f32 %v4507_v42, %v1439_v12  ;;  %v1550_v45 = vadd.f32 %v4509_v24, %v1439_v12  ;;  %v1871_v56 = vsub.f32 1.0, %v1610_v30  ;;  %v4679_v12 = vld [vmem:[%s3868_s12] ss:$0 sm:$0xff]  ;;  %s4711_s12 = scalar_lea.vmem [#allocation11], %s4336_s18 }
 0x266   : > { %3102 = vset.pattern.permute.xlu2 %v3595_v15  ;;  %1668 = vperm.xlu1 %3105, %v1626_v37   ;;  %v1873_v62 = vsub.f32 1.0, %v4639_v40 }
 0x267   : > { %1906 = vperm.xlu2 %3102, %v1868_v19   ;;  %v1480_v23 = vmul.f32 0.5, %v1464_v55  ;;  %v1566_v0 = vmul.f32 0.5, %v1550_v45 }
 0x269   : > { %3223 = vtanh.f32 %v1480_v23 }
 0x26a   : > { %v1391_v46 = vpop.f32.mrf.mxu2  ;;  %3225 = vtanh.f32 %v1479_v13 }
 0x26b   : > { %v1392_v21 = vadd.f32 %v1391_v46, %v4518_v16  ;;  %3227 = vtanh.f32 %v1566_v0 }
 0x26d   : > { %v2897_v47 = vpack.c.bf16 %v1392_v21, %v1390_v25  ;;  %3115 = vset.pattern.permute.xlu0 %v3594_v60  ;;  %v1263_v25 = vpop.f32.mrf.mxu0 }
 0x26e   : > { %3106 = vset.pattern.permute.xlu1 %v3595_v15  ;;  %1779 = vperm.xlu0 %3115, %v4607_v43   ;;  %v1264_v11 = vadd.f32 %v1263_v25, %v4661_v63 }
 0x26f   : > { %2930 = vst [vmem:[%s4526_s9 + $0x30] sm:$0xff] %v2897_v47   ;;  %3107 = vset.pattern.permute.xlu2 %v3594_v60  ;;  %1911 = vperm.xlu1 %3106, %v1869_v22   ;;  %v3224_v37 = vpop.eup %3223 }
 0x270   : > { %1769 = vperm.xlu2 %3107, %v4585_v10   ;;  %v1512_v18 = vadd.f32 1.0, %v3224_v37  ;;  %v3226_v22 = vpop.eup %3225 }
 0x271   : > { %v4617_v28 = vpop.permute.xlu2 %1881  ;;  %v3228_v38 = vpop.eup %3227  ;;  %v1511_v1 = vadd.f32 1.0, %v3226_v22 }
 0x272   : > { %v1394_v17 = vpop.f32.mrf.mxu2  ;;  %v4658_v47 = vmul.f32 0.5, %v1512_v18 }
 0x273   : > { %v1395_v10 = vadd.f32 %v1394_v17, %v4518_v16  ;;  %v4672_v17 = vld [vmem:[%s3862_s15] ss:$0 sm:$0xff]  ;;  %v1527_v39 = vmul.f32 0.5, %v1511_v1  ;;  %s4705_s15 = scalar_lea.vmem [#allocation13], %s4336_s18  ;;  %s4775_s18 = sshll.u32 %s2229_s21, 2 }
 0x274   : > { %s2231_s19 = scalar_lea.hbm %s5066_s27, %s4775_s18 }
 0x275   : > { %v1266_v3 = vpop.f32.mrf.mxu0  ;;  %s2234_s10 = sshll.u32 %s2231_s19, 4  ;;  %s2235_s10 = int_to_ptr.hbm [resolvable:$true] %s2234_s10 }
 0x276   : > { %3116 = vset.pattern.permute.xlu0 %v3595_v15  ;;  %s3377_s17 = sshra.s32 %s2235_s10, 4  ;;  %s3378_s17 = int_to_ptr.hbm [resolvable:$true] %s3377_s17 }
 0x277   : > { %3111 = vset.pattern.permute.xlu1 %v3594_v60  ;;  %2022 = vperm.xlu0 %3116, %v4619_v51   ;;  %v1312_v51 = vpop.f32.mrf.mxu1  ;;  %s3379_s1 = scalar_lea.hbm %s3378_s17, 64  ;;  %p3384_p0 = scmp.lt.s32.totalorder %s3378_s17, %s5067_s20 }
 0x278   : > { %3108 = vset.pattern.permute.xlu2 %v3595_v15  ;;  %1774 = vperm.xlu1 %3111, %v1524_v5   ;;  %v1598_v5 = vadd.f32 1.0, %v3228_v38  ;;  %v1267_v38 = vadd.f32 %v1266_v3, %v4661_v63  ;;  %p3380_p6 = scmp.ne.s32.totalorder %s3378_s17, %s3379_s1  ;;  %p3385_p7 = scmp.lt.s32.totalorder %s3383_s11, %s3379_s1 }
 0x279   : > { %2012 = vperm.xlu2 %3108, %v1609_v52  }
 0x27a   : > { %v4628_v50 = vpop.permute.xlu2 %1739  ;;  %v1396_v8 = vpop.f32.mrf.mxu2  ;;  %v4688_v23 = vmul.f32 0.5, %v1598_v5  ;;  %p3381_p10 = pnand %p3380_p6, %p3760_p12  ;;  %p3386_p8 = por %p3385_p7, %p3384_p0 }
 0x27b   : > { %v1397_v20 = vadd.f32 %v1396_v8, %v4518_v16  ;;  %v1440_v16 = vpop.f32.mrf.mxu3  ;;  %v1311_v8 = vadd.f32 %v1310_v4, %v4668_v59  ;;  %v1816_v55 = vmul.f32 %v4672_v17, %v4628_v50 }
 0x27c   : > { %v1441_v52 = vadd.f32 %v1440_v16, %v4500_v49  ;;  %p3382_p5 = pneg %p3381_p10 }
 0x27d   : > { %v2902_v57 = vpack.c.bf16 %v1397_v20, %v1395_v10  ;;  %v1313_v10 = vadd.f32 %v1312_v51, %v4668_v59 }
 0x27e   : > { %v1465_v14 = vadd.f32 %v4507_v42, %v1441_v52  ;;  %v1551_v21 = vadd.f32 %v4509_v24, %v1441_v52  ;;  %p3387_p9 = pnand %p3386_p8, %p3382_p5 }
 0x27f   : > { %2931 = vst [vmem:[%s4526_s9 + $0x38] sm:$0xff] %v2902_v57   ;;  %3121 = vset.pattern.permute.xlu0 %v3594_v60  ;;  %v1315_v22 = vpop.f32.mrf.mxu1 }
 0x280   : > { %3112 = vset.pattern.permute.xlu1 %v3595_v15  ;;  %1688 = vperm.xlu0 %3121, %v1630_v53   ;;  %v1481_v6 = vmul.f32 0.5, %v1465_v14  ;;  %v1567_v31 = vmul.f32 0.5, %v1551_v21 }
 0x281   : > { %3113 = vset.pattern.permute.xlu2 %v3594_v60  ;;  %2017 = vperm.xlu1 %3112, %v1610_v30  }
 0x282   : > { %1678 = vperm.xlu2 %3113, %v1628_v9   ;;  %3229 = vtanh.f32 %v1481_v6  ;;  %v1959_v9 = vmul.f32 %v4617_v28, %v1311_v8 }
 0x283   : > { %v4642_v33 = vpop.permute.xlu2 %1982  ;;  %v4655_v44 = vpop.f32.mrf.mxu3  ;;  %3231 = vtanh.f32 %v1565_v29 }
 0x284   : > { %3233 = vtanh.f32 %v1567_v31  ;;  %v2059_v50 = vmul.f32 %v4679_v12, %v4642_v33  ;;  %v1444_v18 = vadd.f32 %v4655_v44, %v4500_v49  ;;  %v1268_v44 = vpop.f32.mrf.mxu0 }
 0x285   : > { %v1269_v1 = vadd.f32 %v1268_v44, %v4661_v63 }
 0x286   : > { %v1735_v35 = vpop.permute.xlu0 %1734 }
 0x287   : > { %v1815_v57 = vmul.f32 %v4672_v17, %v1735_v35 }
 0x288   : > { %3122 = vset.pattern.permute.xlu0 %v3595_v15  ;;  %v3230_v36 = vpop.eup %3229 }
 0x289   : > { %3117 = vset.pattern.permute.xlu1 %v3594_v60  ;;  %1931 = vperm.xlu0 %3122, %v1873_v62   ;;  %v1513_v30 = vadd.f32 1.0, %v3230_v36  ;;  %v3232_v52 = vpop.eup %3231 }
 0x28a   : > { %3114 = vset.pattern.permute.xlu2 %v3595_v15  ;;  %1683 = vperm.xlu1 %3117, %v1629_v54   ;;  %v3234_v0 = vpop.eup %3233  ;;  %v1597_v4 = vadd.f32 1.0, %v3232_v52 }
 0x28b   : > { %1921 = vperm.xlu2 %3114, %v1871_v56   ;;  %v1445_v20 = vpop.f32.mrf.mxu3  ;;  %v4701_v54 = vmul.f32 0.5, %v1513_v30  ;;  %v1316_v30 = vadd.f32 %v1315_v22, %v4668_v59 }
 0x28c   : > { %v4652_v19 = vpop.permute.xlu2 %1648  ;;  %v1446_v34 = vadd.f32 %v1445_v20, %v4500_v49  ;;  %v1613_v21 = vmul.f32 0.5, %v1597_v4  ;;  %v1466_v49 = vadd.f32 %v4507_v42, %v1444_v18  ;;  %v1632_v20 = vsub.f32 1.0, %v4658_v47 }
 0x28d   : > { %v1633_v41 = vsub.f32 1.0, %v4701_v54 }
 0x28e   : > { %v1467_v14 = vadd.f32 %v4507_v42, %v1446_v34  ;;  %v1553_v31 = vadd.f32 %v4509_v24, %v1446_v34  ;;  %v1482_v51 = vmul.f32 0.5, %v1466_v49  ;;  %v1718_v42 = vmul.f32 %v4652_v19, %v1267_v38 }
 0x28f   : > { %v1978_v46 = vpop.permute.xlu0 %1977  ;;  %v1874_v19 = vsub.f32 1.0, %v1613_v21 }
 0x290   : > { %v1644_v43 = vpop.permute.xlu1 %1643  ;;  %v1483_v25 = vmul.f32 0.5, %v1467_v14 }
 0x291   : > { %3127 = vset.pattern.permute.xlu0 %v3594_v60  ;;  %v1717_v2 = vmul.f32 %v1644_v43, %v1264_v11  ;;  %v1631_v43 = vsub.f32 1.0, %v1527_v39 }
 0x292   : > { %3118 = vset.pattern.permute.xlu1 %v3595_v15  ;;  %1794 = vperm.xlu0 %3127, %v4658_v47   ;;  %3235 = vtanh.f32 %v1483_v25 }
 0x293   : > { %3119 = vset.pattern.permute.xlu2 %v3594_v60  ;;  %1926 = vperm.xlu1 %3118, %v1872_v48   ;;  %v1832_v53 = vadd.f32 %v1816_v55, %v1717_v2  ;;  %3237 = vtanh.f32 %v1482_v51 }
 0x294   : > { %v4675_v61 = vpop.permute.xlu2 %1653  ;;  %1784 = vperm.xlu2 %3119, %v4626_v58   ;;  %v2058_v58 = vmul.f32 %v4679_v12, %v1978_v46  ;;  %v1599_v46 = vadd.f32 1.0, %v3234_v0 }
 0x295   : > { %v1848_v28 = vmul.f32 0.088388346, %v1832_v53  ;;  %v1719_v5 = vmul.f32 %v4675_v61, %v1269_v1  ;;  %v1552_v61 = vadd.f32 %v4509_v24, %v1444_v18 }
 0x296   : > { %v2074_v35 = vadd.f32 %v2058_v58, %v1959_v9  ;;  %v4722_v29 = vmul.f32 0.5, %v1599_v46 }
 0x298   : > { %v1639_v32 = vpop.permute.xlu0 %1638  ;;  %v1876_v55 = vsub.f32 1.0, %v4722_v29  ;;  %v3236_v58 = vpop.eup %3235 }
 0x299   : > { %v1716_v26 = vmul.f32 %v1639_v32, %v1262_v7  ;;  %v1887_v27 = vpop.permute.xlu1 %1886  ;;  %v1515_v47 = vadd.f32 1.0, %v3236_v58  ;;  %v3238_v34 = vpop.eup %3237 }
 0x29a   : > { %v1960_v16 = vmul.f32 %v1887_v27, %v1313_v10  ;;  %3128 = vset.pattern.permute.xlu0 %v3595_v15  ;;  %v1569_v10 = vmul.f32 0.5, %v1553_v31 }
 0x29b   : > { %v1831_v45 = vadd.f32 %v1815_v57, %v1716_v26  ;;  %3123 = vset.pattern.permute.xlu1 %v3594_v60  ;;  %2037 = vperm.xlu0 %3128, %v4688_v23  }
 0x29c   : > { %v2075_v13 = vadd.f32 %v2059_v50, %v1960_v16  ;;  %3120 = vset.pattern.permute.xlu2 %v3595_v15  ;;  %1789 = vperm.xlu1 %3123, %v1527_v39   ;;  %v1317_v39 = vpop.f32.mrf.mxu1  ;;  %3239 = vtanh.f32 %v1569_v10  ;;  %v1271_v50 = vpop.f32.mrf.mxu0  ;;  %v1568_v16 = vmul.f32 0.5, %v1552_v61 }
 0x29d   : > { %v1847_v33 = vmul.f32 0.088388346, %v1831_v45  ;;  %v4698_v62 = vpop.permute.xlu2 %1896  ;;  %2027 = vperm.xlu2 %3120, %v4639_v40   ;;  %v1318_v9 = vadd.f32 %v1317_v39, %v4668_v59 }
 0x29e   : > { %v2827_v37 = vpack.c.bf16 %v2075_v13, %v2074_v35  ;;  %3241 = vtanh.f32 %v1568_v16 }
 0x29f   : > { %v2787_v56 = vpack.c.bf16 %v1848_v28, %v1847_v33  ;;  %v1962_v52 = vmul.f32 %v4698_v62, %v1318_v9  ;;  %v1531_v28 = vmul.f32 0.5, %v1515_v47  ;;  %v1875_v33 = vsub.f32 1.0, %v4688_v23 }
 0x2a0   : > { %2828 = vst [vmem:[%s4705_s15] sm:$0xff] %v2827_v37   ;;  %v1514_v37 = vadd.f32 1.0, %v3238_v34 }
 0x2a1   : > { %2788 = vst [vmem:[%s4711_s12] sm:$0xff] %v2787_v56   ;;  %v1892_v40 = vpop.permute.xlu0 %1891 }
 0x2a2   : > { %v1745_v6 = vpop.permute.xlu1 %1744  ;;  %v1961_v3 = vmul.f32 %v1892_v40, %v1316_v30  ;;  %v3240_v0 = vpop.eup %3239  ;;  %v1530_v40 = vmul.f32 0.5, %v1514_v37 }
 0x2a3   : > { %3132 = vset.pattern.permute.xlu0 %v3594_v60  ;;  %v1817_v11 = vmul.f32 %v4672_v17, %v1745_v6  ;;  %v1601_v18 = vadd.f32 1.0, %v3240_v0 }
 0x2a4   : > { %3124 = vset.pattern.permute.xlu1 %v3595_v15  ;;  %1703 = vperm.xlu0 %3132, %v1633_v41   ;;  %v3242_v6 = vpop.eup %3241  ;;  %v1273_v23 = vpop.f32.mrf.mxu0 }
 0x2a5   : > { %3125 = vset.pattern.permute.xlu2 %v3594_v60  ;;  %2032 = vperm.xlu1 %3124, %v1613_v21   ;;  %v1833_v36 = vadd.f32 %v1817_v11, %v1718_v42  ;;  %v1320_v46 = vpop.f32.mrf.mxu1  ;;  %v1617_v21 = vmul.f32 0.5, %v1601_v18  ;;  %v1600_v22 = vadd.f32 1.0, %v3242_v6  ;;  %v1274_v11 = vadd.f32 %v1273_v23, %v4661_v63 }
 0x2a6   : > { %v4719_v48 = vpop.permute.xlu2 %1754  ;;  %1693 = vperm.xlu2 %3125, %v1631_v43   ;;  %v1634_v43 = vsub.f32 1.0, %v1530_v40  ;;  %v1321_v58 = vadd.f32 %v1320_v46, %v4668_v59 }
 0x2a7   : > { %v1849_v57 = vmul.f32 0.088388346, %v1833_v36  ;;  %v1616_v44 = vmul.f32 0.5, %v1600_v22  ;;  %v1819_v31 = vmul.f32 %v4672_v17, %v4719_v48 }
 0x2aa   : > { %v1750_v2 = vpop.permute.xlu0 %1749 }
 0x2ab   : > { %v1818_v7 = vmul.f32 %v4672_v17, %v1750_v2  ;;  %v1988_v8 = vpop.permute.xlu1 %1987  ;;  %v1635_v2 = vsub.f32 1.0, %v1531_v28 }
 0x2ac   : > { %3133 = vset.pattern.permute.xlu0 %v3595_v15  ;;  %v2060_v24 = vmul.f32 %v4679_v12, %v1988_v8  ;;  %v1276_v51 = vpop.f32.mrf.mxu0  ;;  %v1877_v8 = vsub.f32 1.0, %v1616_v44 }
 0x2ad   : > { %v1834_v32 = vadd.f32 %v1818_v7, %v1719_v5  ;;  %3129 = vset.pattern.permute.xlu1 %v3594_v60  ;;  %1946 = vperm.xlu0 %3133, %v1876_v55   ;;  %v1322_v5 = vpop.f32.mrf.mxu1 }
 0x2ae   : > { %3126 = vset.pattern.permute.xlu2 %v3595_v15  ;;  %1698 = vperm.xlu1 %3129, %v1632_v20   ;;  %v2076_v14 = vadd.f32 %v2060_v24, %v1961_v3 }
 0x2af   : > { %v1850_v53 = vmul.f32 0.088388346, %v1834_v32  ;;  %v4736_v26 = vpop.permute.xlu2 %1997  ;;  %1936 = vperm.xlu2 %3126, %v1874_v19   ;;  %v1323_v19 = vadd.f32 %v1322_v5, %v4668_v59 }
 0x2b1   : > { %v2792_v27 = vpack.c.bf16 %v1850_v53, %v1849_v57  ;;  %v1878_v53 = vsub.f32 1.0, %v1617_v21 }
 0x2b3   : > { %2911 = vst [vmem:[%s4711_s12 + $0x8] sm:$0xff] %v2792_v27   ;;  %v1993_v45 = vpop.permute.xlu0 %1992  ;;  %v2062_v27 = vmul.f32 %v4679_v12, %v4736_v26 }
 0x2b4   : > { %v2061_v35 = vmul.f32 %v4679_v12, %v1993_v45  ;;  %v1659_v13 = vpop.permute.xlu1 %1658  ;;  %v1278_v47 = vpop.f32.mrf.mxu0 }
 0x2b5   : > { %3136 = vset.pattern.permute.xlu0 %v3594_v60  ;;  %v1279_v34 = vadd.f32 %v1278_v47, %v4661_v63 }
 0x2b6   : > { %v2077_v56 = vadd.f32 %v2061_v35, %v1962_v52  ;;  %3130 = vset.pattern.permute.xlu1 %v3595_v15  ;;  %1809 = vperm.xlu0 %3136, %v1531_v28  }
 0x2b7   : > { %3131 = vset.pattern.permute.xlu2 %v3594_v60  ;;  %1941 = vperm.xlu1 %3130, %v1875_v33  }
 0x2b8   : > { %v2832_v62 = vpack.c.bf16 %v2077_v56, %v2076_v14  ;;  %v1664_v4 = vpop.permute.xlu2 %1663  ;;  %1799 = vperm.xlu2 %3131, %v4701_v54   ;;  %v1272_v54 = vadd.f32 %v1271_v50, %v4661_v63  ;;  %v1325_v50 = vpop.f32.mrf.mxu1 }
 0x2b9   : > { %v1721_v36 = vmul.f32 %v1664_v4, %v1274_v11 }
 0x2ba   : > { %2918 = vst [vmem:[%s4705_s15 + $0x8] sm:$0xff] %v2832_v62   ;;  %v1720_v38 = vmul.f32 %v1659_v13, %v1272_v54 }
 0x2bc   : > { %v4750_v41 = vpop.permute.xlu0 %1764 }
 0x2bd   : > { %v1902_v25 = vpop.permute.xlu1 %1901  ;;  %v1821_v13 = vmul.f32 %v4672_v17, %v4750_v41 }
 0x2be   : > { %3138 = vset.pattern.permute.xlu0 %v3595_v15  ;;  %v1963_v61 = vmul.f32 %v1902_v25, %v1321_v58 }
 0x2bf   : > { %3134 = vset.pattern.permute.xlu1 %v3594_v60  ;;  %2052 = vperm.xlu0 %3138, %v1617_v21   ;;  %v1835_v60 = vadd.f32 %v1819_v31, %v1720_v38 }
 0x2c0   : > { %1708 = vperm.xlu2 %3131, %v1634_v43   ;;  %1804 = vperm.xlu1 %3134, %v1530_v40   ;;  %v2078_v16 = vadd.f32 %v2062_v27, %v1963_v61  ;;  %v1327_v0 = vpop.f32.mrf.mxu1 }
 0x2c1   : > { %v1907_v49 = vpop.permute.xlu2 %1906  ;;  %v1851_v20 = vmul.f32 0.088388346, %v1835_v60 }
 0x2c2   : > { %v1964_v30 = vmul.f32 %v1907_v49, %v1323_v19 }
 0x2c5   : > { %v4758_v1 = vpop.permute.xlu0 %2007 }
 0x2c6   : > { %v1760_v42 = vpop.permute.xlu1 %1759 }
 0x2c7   : > { %v1820_v7 = vmul.f32 %v4672_v17, %v1760_v42 }
 0x2c8   : > { %3135 = vset.pattern.permute.xlu2 %v3595_v15  ;;  %1713 = vperm.xlu1 %3134, %v1635_v2  }
 0x2c9   : > { %v1836_v55 = vadd.f32 %v1820_v7, %v1721_v36  ;;  %1951 = vperm.xlu2 %3135, %v1877_v8  }
 0x2ca   : > { %v1770_v10 = vpop.permute.xlu2 %1769 }
 0x2cb   : > { %v1852_v48 = vmul.f32 0.088388346, %v1836_v55 }
 0x2cd   : > { %v2797_v32 = vpack.c.bf16 %v1852_v48, %v1851_v20 }
 0x2ce   : > { %v1674_v39 = vpop.permute.xlu0 %1673 }
 0x2cf   : > { %2912 = vst [vmem:[%s4711_s12 + $0x10] sm:$0xff] %v2797_v32   ;;  %v2003_v57 = vpop.permute.xlu1 %2002  ;;  %v1723_v52 = vmul.f32 %v1674_v39, %v1279_v34 }
 0x2d0   : > { %v2063_v9 = vmul.f32 %v4679_v12, %v2003_v57  ;;  %3137 = vset.pattern.permute.xlu1 %v3595_v15  ;;  %v1277_v15 = vadd.f32 %v1276_v51, %v4661_v63 }
 0x2d1   : > { %2042 = vperm.xlu2 %3135, %v4722_v29   ;;  %1956 = vperm.xlu1 %3137, %v1878_v53   ;;  %v1822_v29 = vmul.f32 %v4672_v17, %v1770_v10 }
 0x2d2   : > { %v2079_v24 = vadd.f32 %v2063_v9, %v1964_v30 }
 0x2d3   : > { %v4772_v45 = vpop.permute.xlu2 %2012  ;;  %v1838_v28 = vadd.f32 %v1822_v29, %v1723_v52 }
 0x2d4   : > { %v2837_v26 = vpack.c.bf16 %v2079_v24, %v2078_v16 }
 0x2d6   : > { %2919 = vst [vmem:[%s4705_s15 + $0x10] sm:$0xff] %v2837_v26  }
 0x2d7   : > { %v1917_v3 = vpop.permute.xlu0 %1916 }
 0x2d8   : > { %v1669_v35 = vpop.permute.xlu1 %1668 }
 0x2d9   : > { %v1722_v33 = vmul.f32 %v1669_v35, %v1277_v15  ;;  %2047 = vperm.xlu1 %3137, %v1616_v44  }
 0x2db   : > { %v1837_v37 = vadd.f32 %v1821_v13, %v1722_v33 }
 0x2dc   : > { %3390 = shalt.err (!%p3387_p9)
}
 0x2dd   : > { %s3596_s5 = smov 64   ;;  %s3597_s19 = smov 4   ;;  %v1679_v14 = vpop.permute.xlu2 %1678  ;;  %v1854_v56 = vmul.f32 0.088388346, %v1838_v28  ;;  %v1853_v62 = vmul.f32 0.088388346, %v1837_v37  ;;  %v1328_v4 = vadd.f32 %v1327_v0, %v4668_v59  ;;  %v1326_v40 = vadd.f32 %v1325_v50, %v4668_v59 }
 0x2de   : > { %2942 = dma.vmem_to_hbm [thread:$0]  (%p3760_p12), %s2233_s4, 1024, %s2235_s10, %s2203_s13, %s3596_s5, %s3596_s5, %s3597_s19  }
 0x2df   : > { %s5069_s1 = sld [smem:[#allocation43_spill]]  ;;  %v2802_v18 = vpack.c.bf16 %v1854_v56, %v1853_v62  ;;  %v1966_v6 = vmul.f32 %v1917_v3, %v1328_v4  ;;  %s2218_s9 = scalar_lea.sflag [#allocation15], %s3848_s28 }
 0x2e0   : > { %v1780_v23 = vpop.permute.xlu0 %1779 }
 0x2e5   : > { %s2288_s21 = scalar_lea.hbm %s5069_s1, %s4775_s18  ;;  %s3411_s27 = scalar_lea.hbm %s5069_s1, 256 }
 0x2e6   : > { %s2291_s24 = sshll.u32 %s2288_s21, 4  ;;  %s2292_s24 = int_to_ptr.hbm [resolvable:$true] %s2291_s24 }
 0x2e7   : > { %s3405_s4 = sshra.s32 %s2292_s24, 4  ;;  %s3406_s4 = int_to_ptr.hbm [resolvable:$true] %s3405_s4 }
 0x2e8   : > { %s3407_s10 = scalar_lea.hbm %s3406_s4, 64  ;;  %p3412_p4 = scmp.lt.s32.totalorder %s3406_s4, %s5069_s1 }
 0x2e9   : > { %p3408_p11 = scmp.ne.s32.totalorder %s3406_s4, %s3407_s10  ;;  %p3413_p3 = scmp.lt.s32.totalorder %s3411_s27, %s3407_s10 }
 0x2eb   : > { %p3409_p1 = pnand %p3408_p11, %p3760_p12  ;;  %p3414_p6 = por %p3413_p3, %p3412_p4 }
 0x2ed   : > { %p3410_p2 = pneg %p3409_p1 }
 0x2ef   : > { %p3415_p10 = pnand %p3414_p6, %p3410_p2 }
 0x2f1   : > { %3418 = shalt.err (!%p3415_p10)
}
 0x2f2   : > { %2945 = dma.vmem_to_hbm [thread:$0]  (%p3760_p12), %s4804_s7, 1024, %s2292_s24, %s2218_s9, %s3596_s5, %s3596_s5, %s3597_s19   ;;  %v1912_v41 = vpop.permute.xlu1 %1911  ;;  %v2064_v46 = vmul.f32 %v4679_v12, %v4758_v1  ;;  %v2065_v25 = vmul.f32 %v4679_v12, %v4772_v45  ;;  %v1922_v54 = vpop.permute.xlu2 %1921  ;;  %v1824_v48 = vmul.f32 %v4672_v17, %v1780_v23 }
 0x2f3   : > { %2913 = vst [vmem:[%s4711_s12 + $0x18] sm:$0xff] %v2802_v18   ;;  %v1965_v21 = vmul.f32 %v1912_v41, %v1326_v40  ;;  %v1281_v49 = vpop.f32.mrf.mxu0  ;;  %v2023_v38 = vpop.permute.xlu0 %2022  ;;  %s5070_s21 = sld [smem:[#allocation41_spill]]  ;;  %s2251_s4 = sshll.u32 %s4711_s12, 4  ;;  %s2252_s4 = int_to_ptr.vmem [resolvable:$true] %s2251_s4 }
 0x2f4   : > { %v2081_v43 = vadd.f32 %v2065_v25, %v1966_v6  ;;  %v1330_v5 = vpop.f32.mrf.mxu1  ;;  %v1282_v1 = vadd.f32 %v1281_v49, %v4661_v63  ;;  %v2067_v34 = vmul.f32 %v4679_v12, %v2023_v38  ;;  %s5072_s13 = sand.u32 1, %s3717_s14  }
 0x2f5   : > { %v2080_v22 = vadd.f32 %v2064_v46, %v1965_v21  ;;  %v1331_v27 = vadd.f32 %v1330_v5, %v4668_v59  ;;  %s4877_s11 = scalar_lea.sflag [#allocation12], %s5072_s13 }
 0x2f6   : > { %v1724_v55 = vmul.f32 %v1679_v14, %v1282_v1 }
 0x2f7   : > { %v2842_v44 = vpack.c.bf16 %v2081_v43, %v2080_v22  ;;  %v1967_v24 = vmul.f32 %v1922_v54, %v1331_v27 }
 0x2f9   : > { %2920 = vst [vmem:[%s4705_s15 + $0x18] sm:$0xff] %v2842_v44   ;;  %s5071_s9 = smov %s5070_s21  ;;  %s2250_s24 = scalar_lea.hbm %s5070_s21, %s4775_s18 }
 0x2fa   : > { %v1775_v11 = vpop.permute.xlu1 %1774  ;;  %v1785_v31 = vpop.permute.xlu2 %1784  ;;  %s2253_s10 = sshll.u32 %s2250_s24, 4  ;;  %s3439_s7 = scalar_lea.hbm %s5071_s9, 256  ;;  %s2254_s10 = int_to_ptr.hbm [resolvable:$true] %s2253_s10 }
 0x2fb   : > { %v1283_v51 = vpop.f32.mrf.mxu0  ;;  %v1689_v42 = vpop.permute.xlu0 %1688  ;;  %v1823_v36 = vmul.f32 %v4672_v17, %v1775_v11  ;;  %v1825_v0 = vmul.f32 %v4672_v17, %v1785_v31  ;;  %s3433_s27 = sshra.s32 %s2254_s10, 4  ;;  %s3434_s27 = int_to_ptr.hbm [resolvable:$true] %s3433_s27 }
 0x2fc   : > { %v1284_v8 = vadd.f32 %v1283_v51, %v4661_v63  ;;  %v1332_v19 = vpop.f32.mrf.mxu1  ;;  %s3435_s29 = scalar_lea.hbm %s3434_s27, 64  ;;  %p3440_p8 = scmp.lt.s32.totalorder %s3434_s27, %s5071_s9 }
 0x2fd   : > { %v1839_v58 = vadd.f32 %v1823_v36, %v1724_v55  ;;  %v1333_v30 = vadd.f32 %v1332_v19, %v4668_v59  ;;  %p3436_p5 = scmp.ne.s32.totalorder %s3434_s27, %s3435_s29  ;;  %p3441_p9 = scmp.lt.s32.totalorder %s3439_s7, %s3435_s29 }
 0x2ff   : > { %v1855_v57 = vmul.f32 0.088388346, %v1839_v58  ;;  %p3437_p0 = pnand %p3436_p5, %p3760_p12  ;;  %p3442_p11 = por %p3441_p9, %p3440_p8 }
 0x301   : > { %p3438_p7 = pneg %p3437_p0 }
 0x302   : > { %v2018_v2 = vpop.permute.xlu1 %2017  ;;  %v2028_v60 = vpop.permute.xlu2 %2027 }
 0x303   : > { %v1286_v7 = vpop.f32.mrf.mxu0  ;;  %v1932_v10 = vpop.permute.xlu0 %1931  ;;  %v2066_v50 = vmul.f32 %v4679_v12, %v2018_v2  ;;  %v2068_v44 = vmul.f32 %v4679_v12, %v2028_v60  ;;  %p3443_p1 = pnand %p3442_p11, %p3438_p7 }
 0x304   : > { %v1287_v29 = vadd.f32 %v1286_v7, %v4661_v63  ;;  %v1335_v3 = vpop.f32.mrf.mxu1 }
 0x305   : > { %v2082_v52 = vadd.f32 %v2066_v50, %v1967_v24  ;;  %v1336_v25 = vadd.f32 %v1335_v3, %v4668_v59 }
 0x306   : > { %v1726_v28 = vmul.f32 %v1689_v42, %v1287_v29 }
 0x307   : > { %v1969_v22 = vmul.f32 %v1932_v10, %v1336_v25 }
 0x308   : > { %v1841_v56 = vadd.f32 %v1825_v0, %v1726_v28 }
 0x309   : > { %v2084_v31 = vadd.f32 %v2068_v44, %v1969_v22 }
 0x30a   : > { %v1684_v20 = vpop.permute.xlu1 %1683  ;;  %v1694_v39 = vpop.permute.xlu2 %1693  ;;  %v1857_v41 = vmul.f32 0.088388346, %v1841_v56 }
 0x30b   : > { %v1725_v32 = vmul.f32 %v1684_v20, %v1284_v8  ;;  %v1288_v9 = vpop.f32.mrf.mxu0  ;;  %v1795_v45 = vpop.permute.xlu0 %1794 }
 0x30c   : > { %v1289_v33 = vadd.f32 %v1288_v9, %v4661_v63  ;;  %v1337_v23 = vpop.f32.mrf.mxu1  ;;  %v1827_v60 = vmul.f32 %v4672_v17, %v1795_v45 }
 0x30d   : > { %v1840_v61 = vadd.f32 %v1824_v48, %v1725_v32  ;;  %v1338_v43 = vadd.f32 %v1337_v23, %v4668_v59 }
 0x30e   : > { %v1727_v62 = vmul.f32 %v1694_v39, %v1289_v33 }
 0x30f   : > { %v1856_v53 = vmul.f32 0.088388346, %v1840_v61 }
 0x311   : > { %v2807_v47 = vpack.c.bf16 %v1856_v53, %v1855_v57 }
 0x312   : > { %v1927_v16 = vpop.permute.xlu1 %1926  ;;  %v1937_v35 = vpop.permute.xlu2 %1936 }
 0x313   : > { %2914 = vst [vmem:[%s4711_s12 + $0x20] sm:$0xff] %v2807_v47   ;;  %v1968_v26 = vmul.f32 %v1927_v16, %v1333_v30  ;;  %v1291_v37 = vpop.f32.mrf.mxu0  ;;  %v2038_v18 = vpop.permute.xlu0 %2037  ;;  %v1970_v38 = vmul.f32 %v1937_v35, %v1338_v43 }
 0x314   : > { %v1340_v36 = vpop.f32.mrf.mxu1  ;;  %v1292_v8 = vadd.f32 %v1291_v37, %v4661_v63  ;;  %v2070_v9 = vmul.f32 %v4679_v12, %v2038_v18 }
 0x315   : > { %v2083_v15 = vadd.f32 %v2067_v34, %v1968_v26  ;;  %v1341_v53 = vadd.f32 %v1340_v36, %v4668_v59 }
 0x317   : > { %v2847_v13 = vpack.c.bf16 %v2083_v15, %v2082_v52 }
 0x319   : > { %2921 = vst [vmem:[%s4705_s15 + $0x20] sm:$0xff] %v2847_v13  }
 0x31a   : > { %v1790_v14 = vpop.permute.xlu1 %1789  ;;  %v1800_v6 = vpop.permute.xlu2 %1799 }
 0x31b   : > { %v1826_v4 = vmul.f32 %v4672_v17, %v1790_v14  ;;  %v1293_v49 = vpop.f32.mrf.mxu0  ;;  %v1704_v51 = vpop.permute.xlu0 %1703  ;;  %v1828_v55 = vmul.f32 %v4672_v17, %v1800_v6 }
 0x31c   : > { %v1294_v5 = vadd.f32 %v1293_v49, %v4661_v63  ;;  %v1342_v39 = vpop.f32.mrf.mxu1 }
 0x31d   : > { %v1842_v40 = vadd.f32 %v1826_v4, %v1727_v62  ;;  %v1343_v30 = vadd.f32 %v1342_v39, %v4668_v59 }
 0x31e   : > { %v1729_v7 = vmul.f32 %v1704_v51, %v1294_v5 }
 0x31f   : > { %v1858_v46 = vmul.f32 0.088388346, %v1842_v40 }
 0x320   : > { %v1844_v20 = vadd.f32 %v1828_v55, %v1729_v7 }
 0x321   : > { %v2812_v21 = vpack.c.bf16 %v1858_v46, %v1857_v41 }
 0x322   : > { %v2033_v54 = vpop.permute.xlu1 %2032  ;;  %v1709_v2 = vpop.permute.xlu2 %1708  ;;  %v1860_v19 = vmul.f32 0.088388346, %v1844_v20 }
 0x323   : > { %2915 = vst [vmem:[%s4711_s12 + $0x28] sm:$0xff] %v2812_v21   ;;  %v2069_v11 = vmul.f32 %v4679_v12, %v2033_v54  ;;  %v1947_v47 = vpop.permute.xlu0 %1946  ;;  %v1296_v24 = vpop.f32.mrf.mxu0 }
 0x324   : > { %v1972_v34 = vmul.f32 %v1947_v47, %v1343_v30  ;;  %v1297_v35 = vadd.f32 %v1296_v24, %v4661_v63  ;;  %v1345_v14 = vpop.f32.mrf.mxu1 }
 0x325   : > { %v2085_v42 = vadd.f32 %v2069_v11, %v1970_v38 }
 0x326   : > { %v1730_v0 = vmul.f32 %v1709_v2, %v1297_v35 }
 0x327   : > { %v2852_v1 = vpack.c.bf16 %v2085_v42, %v2084_v31 }
 0x329   : > { %2922 = vst [vmem:[%s4705_s15 + $0x28] sm:$0xff] %v2852_v1  }
 0x32a   : > { %v1699_v10 = vpop.permute.xlu1 %1698  ;;  %v4857_v32 = vpop.permute.xlu2 %1951 }
 0x32b   : > { %v1728_v48 = vmul.f32 %v1699_v10, %v1292_v8  ;;  %v1298_v3 = vpop.f32.mrf.mxu0  ;;  %v1810_v28 = vpop.permute.xlu0 %1809 }
 0x32c   : > { %v1299_v33 = vadd.f32 %v1298_v3, %v4661_v63  ;;  %v1830_v56 = vmul.f32 %v4672_v17, %v1810_v28 }
 0x32d   : > { %v1843_v58 = vadd.f32 %v1827_v60, %v1728_v48 }
 0x32f   : > { %v1859_v61 = vmul.f32 0.088388346, %v1843_v58 }
 0x331   : > { %v2817_v57 = vpack.c.bf16 %v1860_v19, %v1859_v61 }
 0x332   : > { %v1942_v27 = vpop.permute.xlu1 %1941  ;;  %v2043_v16 = vpop.permute.xlu2 %2042 }
 0x333   : > { %2916 = vst [vmem:[%s4711_s12 + $0x30] sm:$0xff] %v2817_v57   ;;  %v1971_v50 = vmul.f32 %v1942_v27, %v1341_v53  ;;  %v2071_v26 = vmul.f32 %v4679_v12, %v2043_v16 }
 0x335   : > { %v2086_v45 = vadd.f32 %v2070_v9, %v1971_v50  ;;  %v2087_v52 = vadd.f32 %v2071_v26, %v1972_v34 }
 0x337   : > { %v2857_v15 = vpack.c.bf16 %v2087_v52, %v2086_v45 }
 0x339   : > { %2923 = vst [vmem:[%s4705_s15 + $0x30] sm:$0xff] %v2857_v15  }
 0x33a   : > { %v1805_v29 = vpop.permute.xlu1 %1804 }
 0x33b   : > { %v1829_v13 = vmul.f32 %v4672_v17, %v1805_v29 }
 0x33d   : > { %v1845_v62 = vadd.f32 %v1829_v13, %v1730_v0 }
 0x33f   : > { %v1861_v40 = vmul.f32 0.088388346, %v1845_v62 }
 0x342   : > { %v1714_v37 = vpop.permute.xlu1 %1713 }
 0x343   : > { %v1731_v4 = vmul.f32 %v1714_v37, %v1299_v33 }
 0x345   : > { %v1846_v18 = vadd.f32 %v1830_v56, %v1731_v4 }
 0x347   : > { %v1862_v6 = vmul.f32 0.088388346, %v1846_v18 }
 0x349   : > { %v2822_v63 = vpack.c.bf16 %v1862_v6, %v1861_v40 }
 0x34a   : > { %v1957_v23 = vpop.permute.xlu1 %1956 }
 0x34b   : > { %2917 = vst [vmem:[%s4711_s12 + $0x38] sm:$0xff] %v2822_v63  }
 0x34c   : > { %3446 = shalt.err (!%p3443_p1)
}
 0x34d   : > { %2943 = dma.vmem_to_hbm [thread:$0]  (%p3760_p12), %s2252_s4, 1024, %s2254_s10, %s4877_s11, %s3596_s5, %s3596_s5, %s3597_s19   ;;  %v1347_v17 = vpop.f32.mrf.mxu1  ;;  %v2053_v46 = vpop.permute.xlu0 %2052  ;;  %v1346_v25 = vadd.f32 %v1345_v14, %v4668_v59 }
 0x34e   : > { %v1348_v41 = vadd.f32 %v1347_v17, %v4668_v59  ;;  %s5073_s13 = sld [smem:[#allocation42_spill]]  ;;  %v2073_v54 = vmul.f32 %v4679_v12, %v2053_v46  ;;  %s2270_s4 = sshll.u32 %s4705_s15, 4  ;;  %s2271_s4 = int_to_ptr.vmem [resolvable:$true] %s2270_s4 }
 0x34f   : > { %v1973_v22 = vmul.f32 %v4857_v32, %v1346_v25 }
 0x350   : > { %v1974_v21 = vmul.f32 %v1957_v23, %v1348_v41 }
 0x352   : > { %v2048_v43 = vpop.permute.xlu1 %2047  ;;  %v2089_v44 = vadd.f32 %v2073_v54, %v1974_v21 }
 0x353   : > { %v2072_v49 = vmul.f32 %v4679_v12, %v2048_v43 }
 0x354   : > { %s5074_s17 = smov %s5073_s13  ;;  %s2269_s27 = scalar_lea.hbm %s5073_s13, %s4775_s18 }
 0x355   : > { %s2272_s10 = sshll.u32 %s2269_s27, 4  ;;  %v2088_v38 = vadd.f32 %v2072_v49, %v1973_v22  ;;  %s3467_s21 = scalar_lea.hbm %s5074_s17, 256  ;;  %s2273_s10 = int_to_ptr.hbm [resolvable:$true] %s2272_s10 }
 0x356   : > { %s3461_s29 = sshra.s32 %s2273_s10, 4  ;;  %s3462_s29 = int_to_ptr.hbm [resolvable:$true] %s3461_s29 }
 0x357   : > { %v2862_v11 = vpack.c.bf16 %v2089_v44, %v2088_v38  ;;  %s3463_s28 = scalar_lea.hbm %s3462_s29, 64  ;;  %p3468_p6 = scmp.lt.s32.totalorder %s3462_s29, %s5074_s17 }
 0x358   : > { %p3464_p2 = scmp.ne.s32.totalorder %s3462_s29, %s3463_s28  ;;  %p3469_p10 = scmp.lt.s32.totalorder %s3467_s21, %s3463_s28 }
 0x359   : > { %2924 = vst [vmem:[%s4705_s15 + $0x38] sm:$0xff] %v2862_v11  }
 0x35a   : > { %p3465_p4 = pnand %p3464_p2, %p3760_p12  ;;  %p3470_p5 = por %p3469_p10, %p3468_p6 }
 0x35c   : > { %p3466_p3 = pneg %p3465_p4 }
 0x35e   : > { %p3471_p0 = pnand %p3470_p5, %p3466_p3 }
 0x360   : > { %3474 = shalt.err (!%p3471_p0)
}
 0x361   : > { %2944 = dma.vmem_to_hbm [thread:$0]  (%p3760_p12), %s2271_s4, 1024, %s2273_s10, %s4877_s11, %s3596_s5, %s3596_s5, %s3597_s19  }
 0x362 PF: > { %s5075_s15 = sld [smem:[#allocation26_spill]] }
 0x363   : > { %s5076_s12 = sld [smem:[#allocation22_spill]] }
 0x368   : > { %p2980_p7 = scmp.ge.s32.totalorder %s5075_s15, 2 }
 0x369   : > { %s2306_s27 = sand.u32 1, %s5076_s12  }
 0x36a   : > { %p2965_p8 = pnand %p2980_p7, %p3764_p13  ;;  %s2307_s29 = scalar_lea.sflag [#allocation4], %s2306_s27 }
 0x36c   : > { %p2966_p9 = pneg %p2965_p8 }
 0x36e   : > { %3532 = dma.done.wait (%p2966_p9), %s2307_s29, 1024  }
 0x36f   : > { %3534 = vsyncadd (%p2966_p9), %s2307_s29, 4294966272  ;;  %s5078_s28 = sadd.s32 4294967294, %s5075_s15  }
 0x370   : > { %s2316_s8 = sand.u32 1, %s5078_s28  }
 0x371   : > { %s2317_s18 = scalar_lea.sflag [#allocation12], %s2316_s8 }
 0x372   : > { %3536 = dma.done.wait (%p2966_p9), %s2317_s18, 2048  }
 0x373   : > { %3538 = vsyncadd (%p2966_p9), %s2317_s18, 4294965248  ;;  %s2337_s7 = scalar_lea.sflag [#allocation15], %s2306_s27 }
 0x374   : > { %3540 = dma.done.wait (%p2966_p9), %s2337_s7, 1024  }
 0x375   : > { %3542 = vsyncadd (%p2966_p9), %s2337_s7, 4294966272  ;;  %s39_s13 = sadd.s32 1, %s5075_s15   ;;  %s5079_s5 = sld [smem:[#allocation32_spill]] }
 0x376   : > { %p36_p12 = scmp.ge.s32.totalorder %s39_s13, 6   ;;  %s5080_s27 = sld [smem:[#allocation25_spill]] }
 0x377   : > { %s5081_s29 = sld [smem:[#allocation30_spill]]  ;;  %s5083_s21 = smov %s3549_s22 }
 0x378   : > { %s5082_s19 = sld [smem:[#allocation31_spill]]  ;;  %s5084_s22 = smov %s3553_s23 }
 0x379   : > { %s5085_s23 = smov %s3826_s16  ;;  %s5086_s24 = smov %s3561_s25 }
 0x37a   : > { %s5087_s25 = smov %s3565_s26  ;;  %s5089_s28 = smov %s3581_s30 }
 0x37b   : > { %s5088_s26 = smov %s5079_s5  ;;  %38 = sbr.rel (!%p36_p12) target bundleno = 28 (0x1c), region = 184 }
 0x37e   : > { %s5090_s30 = smov %s5082_s19 }
 0x380   :  { %2343 = vsyncpa [#allocation3], 1 }
 0x381   :  { %2345 = vsyncpa [#allocation3 + $0x1], 1 }
 0x382   :  { %2346 = vsyncpa [#allocation6], 1 }
 0x383   :  { %2348 = vsyncpa [#allocation6 + $0x1], 1 }
 0x384   :  { %2349 = vsyncpa [#allocation9], 1 }
 0x385   :  { %2350 = vsyncpa [#allocation4], 1 }
 0x386   :  { %2352 = vsyncpa [#allocation4 + $0x1], 1 }
 0x387   :  { %2353 = vsyncpa [#allocation12], 1 }
 0x388   :  { %2355 = vsyncpa [#allocation12 + $0x1], 1 }
 0x389   :  { %2356 = vsyncpa [#allocation15], 1 }
 0x38a   :  { %2358 = vsyncpa [#allocation15 + $0x1], 1 }

</bundles_post_ra>
